<compile_context>
chip_gen: v5e
topology: v5e:2x2
jax: 0.10.0
libtpu: 0.0.40
codegen_flags: <defaults>
</compile_context>

<pallas_src>
import functools

import jax
import jax.numpy as jnp
import numpy as np
from jax import lax
from jax.experimental import pallas as pl
from jax.experimental.pallas import tpu as pltpu

K = 3  # every conv / conv-transpose in the module uses kernel_size=3
ENC_CH = ((3, 16), (16, 32), (32, 64), (64, 128))
DEC_CH = ((128, 64), (64, 32), (32, 16), (16, 3))

# Sub-pixel decomposition of ConvTranspose2d(k=3, s=2, p=1, output_padding=1):
# output pixel y[2r+py, 2c+px] = sum over taps (i, j) of x[r+i, c+j] . w_eq[ky, kx]
# where w_eq[ky, kx] = w[:, :, 2-ky, 2-kx] (flipped kernel, channels swapped).
_PHASE_TAPS = {
    (0, 0): {(0, 0): (1, 1)},
    (0, 1): {(0, 0): (1, 0), (0, 1): (1, 2)},
    (1, 0): {(0, 0): (0, 1), (1, 0): (2, 1)},
    (1, 1): {(0, 0): (0, 0), (0, 1): (0, 2), (1, 0): (2, 0), (1, 1): (2, 2)},
}


def _round_up(x, m):
    return ((x + m - 1) // m) * m


# ----------------------------------------------------------------------------
# Pallas kernel: act((patches @ W) + b), fused (MXU matmul + VPU/EUP epilogue)
# ----------------------------------------------------------------------------
def _fused_matmul_kernel(p_ref, w_ref, b_ref, o_ref, *, act):
    acc = jnp.dot(p_ref[...], w_ref[...], preferred_element_type=jnp.float32)
    acc = acc + b_ref[...]
    if act == "relu":
        acc = jnp.maximum(acc, 0.0)
    elif act == "sigmoid":
        # sigmoid(x) = 0.5*(tanh(x/2)+1): tanh goes to the EUP slot, no VPU divide,
        # and stays within f32 accuracy (passes the 1e-4 reference check).
        acc = 0.5 * (jnp.tanh(acc * 0.5) + 1.0)
    o_ref[...] = acc.astype(o_ref.dtype)  # single store epilogue (v5e: one vst slot)


def fused_matmul(patches, w_pad, b_pad, n_real, act):
    """act((patches @ W) + b).

    patches: (M, Kd) f32 (unpadded); w_pad: (Kd_pad, N_pad) pre-padded packed weight;
    b_pad: (1, N_pad). Returns (M, n_real) f32.
    """
    M, Kd = patches.shape
    Kd_pad, N_pad = w_pad.shape

    # One big M block per layer (all layers here have M <= 128 at batch=2). If M grows,
    # fall back to 256-row tiles with a parallel grid so both v7x TensorCores get work.
    M8 = _round_up(M, 8)
    if M8 <= 256:
        tm, M_pad = M8, M8
    else:
        tm, M_pad = 256, _round_up(M, 256)

    p = jnp.pad(patches, ((0, M_pad - M), (0, Kd_pad - Kd)))

    out = pl.pallas_call(
        functools.partial(_fused_matmul_kernel, act=act),
        out_shape=jax.ShapeDtypeStruct((M_pad, N_pad), jnp.float32),
        grid_spec=pltpu.PrefetchScalarGridSpec(
            num_scalar_prefetch=0,
            grid=(M_pad // tm,),
            in_specs=[
                pl.BlockSpec((tm, Kd_pad), lambda i: (i, 0)),     # patch rows tile (lane-dense)
                pl.BlockSpec((Kd_pad, N_pad), lambda i: (0, 0)),  # full packed weight (resident)
                pl.BlockSpec((1, N_pad), lambda i: (0, 0)),       # bias row
            ],
            out_specs=pl.BlockSpec((tm, N_pad), lambda i: (i, 0)),
        ),
        compiler_params=pltpu.CompilerParams(dimension_semantics=("parallel",)),
    )(p, w_pad, b_pad)
    return out[:M, :n_real]


# ----------------------------------------------------------------------------
# im2col glue (plain JAX, fused under jit) for conv / transposed conv
# ----------------------------------------------------------------------------
def _im2col(x, stride, pad):
    """x: (B,H,W,C) -> (B*Ho*Wo, K*K*C), patch rows ordered (dy, dx, c)."""
    B, H, W, C = x.shape
    (pt, pb), (plft, prgt) = pad
    xp = jnp.pad(x, ((0, 0), (pt, pb), (plft, prgt), (0, 0)))
    Hp, Wp = H + pt + pb, W + plft + prgt
    Ho = (Hp - K) // stride + 1
    Wo = (Wp - K) // stride + 1
    cols = []
    for dy in range(K):
        for dx in range(K):
            cols.append(xp[:, dy:dy + stride * (Ho - 1) + 1:stride,
                           dx:dx + stride * (Wo - 1) + 1:stride, :])
    p = jnp.stack(cols, axis=3)  # (B, Ho, Wo, K*K, C)
    return p.reshape(B * Ho * Wo, K * K * C), (B, Ho, Wo)


def conv2d_s2(x, w_pad, b_pad, cout, act):
    """Conv2d(kernel=3, stride=2, padding=1) on NHWC, packed/padded weight."""
    patches, (B, Ho, Wo) = _im2col(x, stride=2, pad=((1, 1), (1, 1)))
    y = fused_matmul(patches, w_pad, b_pad, cout, act)
    return y.reshape(B, Ho, Wo, cout)


def conv_transpose2d_s2(x, w_pad, b_pad, cout, act):
    """ConvTranspose2d(kernel=3, stride=2, padding=1, output_padding=1) via the
    sub-pixel (phase) decomposition: 2x2 im2col over the *un-dilated* input, one
    matmul with a (4*Cin, 4*Cout) packed weight, then pixel-shuffle interleave."""
    B, H, W, Cin = x.shape
    xp = jnp.pad(x, ((0, 0), (0, 1), (0, 1), (0, 0)))  # bottom/right zero taps
    taps = [xp[:, i:i + H, j:j + W, :] for i in (0, 1) for j in (0, 1)]
    patches = jnp.stack(taps, axis=3).reshape(B * H * W, 4 * Cin)  # tap-major, then C
    y = fused_matmul(patches, w_pad, b_pad, 4 * cout, act)          # (M, 4*Cout)
    y = y.reshape(B, H, W, 2, 2, cout)                               # (..., py, px, Cout)
    return jnp.transpose(y, (0, 1, 3, 2, 4, 5)).reshape(B, 2 * H, 2 * W, cout)


# ----------------------------------------------------------------------------
# Parameters: PyTorch-style init + one-time packing/padding (off the forward path)
# ----------------------------------------------------------------------------
def init_params(key):
    params = {"enc": [], "dec": []}
    for cin, cout in ENC_CH:
        key, k1, k2 = jax.random.split(key, 3)
        bound = 1.0 / np.sqrt(cin * K * K)
        w = jax.random.uniform(k1, (cout, cin, K, K), jnp.float32, -bound, bound)
        b = jax.random.uniform(k2, (cout,), jnp.float32, -bound, bound)
        params["enc"].append((w, b))
    for cin, cout in DEC_CH:
        key, k1, k2 = jax.random.split(key, 3)
        bound = 1.0 / np.sqrt(cin * K * K)
        w = jax.random.uniform(k1, (cin, cout, K, K), jnp.float32, -bound, bound)
        b = jax.random.uniform(k2, (cout,), jnp.float32, -bound, bound)
        params["dec"].append((w, b))
    return params


def pack_params(params):
    """One-time transpose/pack/pad of all weights & biases into matmul-ready form."""
    enc_packed = []
    for w, b in params["enc"]:
        cout, cin = w.shape[0], w.shape[1]
        w_mat = jnp.transpose(w, (2, 3, 1, 0)).reshape(K * K * cin, cout)  # (dy,dx,c) rows
        kd, n = w_mat.shape
        kd_pad, n_pad = _round_up(kd, 128), _round_up(n, 128)
        w_p = jnp.pad(w_mat, ((0, kd_pad - kd), (0, n_pad - n)))
        b_p = jnp.pad(b, (0, n_pad - n)).reshape(1, n_pad)
        enc_packed.append((w_p, b_p))

    dec_packed = []
    for w, b in params["dec"]:
        cin, cout = w.shape[0], w.shape[1]
        w_eq = jnp.transpose(w[:, :, ::-1, ::-1], (2, 3, 0, 1))  # (K, K, Cin, Cout)
        wp = jnp.zeros((4 * cin, 4 * cout), jnp.float32)
        for (py, px), taps in _PHASE_TAPS.items():
            q = py * 2 + px
            for (i, j), (ky, kx) in taps.items():
                t = i * 2 + j
                wp = wp.at[t * cin:(t + 1) * cin, q * cout:(q + 1) * cout].set(w_eq[ky, kx])
        kd, n = wp.shape
        kd_pad, n_pad = _round_up(kd, 128), _round_up(n, 128)
        w_p = jnp.pad(wp, ((0, kd_pad - kd), (0, n_pad - n)))
        b_p = jnp.pad(jnp.tile(b, 4), (0, n_pad - n)).reshape(1, n_pad)
        dec_packed.append((w_p, b_p))
    return tuple(enc_packed), tuple(dec_packed)


# ----------------------------------------------------------------------------
# Forward (wrapper: NCHW in/out, like the PyTorch module)
# ----------------------------------------------------------------------------
def autoencoder_forward(x_nchw, enc_packed, dec_packed):
    x = jnp.transpose(x_nchw, (0, 2, 3, 1))  # NCHW -> NHWC
    for (_cin, cout), (w, b) in zip(ENC_CH, enc_packed):
        x = conv2d_s2(x, w, b, cout, "relu")
    for i, ((_cin, cout), (w, b)) in enumerate(zip(DEC_CH, dec_packed)):
        act = "sigmoid" if i == len(DEC_CH) - 1 else "relu"
        x = conv_transpose2d_s2(x, w, b, cout, act)
    return jnp.transpose(x, (0, 3, 1, 2))  # NHWC -> NCHW


# Pure-JAX reference (lax convs, raw PyTorch-layout params) for a numerical cross-check.
def reference_forward(x_nchw, params):
    x = x_nchw
    for w, b in params["enc"]:
        x = lax.conv_general_dilated(x, w, (2, 2), ((1, 1), (1, 1)),
                                     dimension_numbers=("NCHW", "OIHW", "NCHW"))
        x = jnp.maximum(x + b[None, :, None, None], 0.0)
    n_dec = len(params["dec"])
    for i, (w, b) in enumerate(params["dec"]):
        w_eq = jnp.transpose(w[:, :, ::-1, ::-1], (1, 0, 2, 3))  # (Cout, Cin, K, K)
        x = lax.conv_general_dilated(x, w_eq, (1, 1), ((1, 2), (1, 2)),
                                     lhs_dilation=(2, 2),
                                     dimension_numbers=("NCHW", "OIHW", "NCHW"))
        x = x + b[None, :, None, None]
        x = 1.0 / (1.0 + jnp.exp(-x)) if i == n_dec - 1 else jnp.maximum(x, 0.0)
    return x


if __name__ == "__main__":
    key = jax.random.PRNGKey(0)
    kx, kp = jax.random.split(key)
    x = jax.random.uniform(kx, (2, 3, 16, 16), jnp.float32)  # NCHW, like PyTorch
    params = init_params(kp)
    enc_packed, dec_packed = pack_params(params)  # one-time weight repack, off the hot path

    fwd = jax.jit(autoencoder_forward)
    out = jax.block_until_ready(fwd(x, enc_packed, dec_packed))
    assert out.shape == (2, 3, 16, 16), out.shape

    ref = reference_forward(x, params)
    assert np.allclose(np.asarray(out), np.asarray(ref), atol=1e-4, rtol=1e-4)
    print("KERNEL_OK")
</pallas_src>

<mosaic_0001>
module attributes {stable_mosaic.version = 11 : i64} {
  func.func @_fused_matmul_kernel(%arg0: i32, %arg1: memref<128x128xf32, #tpu.memory_space<vmem>>, %arg2: memref<128x128xf32, #tpu.memory_space<vmem>>, %arg3: memref<1x128xf32, #tpu.memory_space<vmem>>, %arg4: memref<128x128xf32, #tpu.memory_space<vmem>>) attributes {dimension_semantics = [#tpu.dimension_semantics<parallel>], iteration_bounds = array<i64: 1>, scalar_prefetch = 0 : i64, scratch_operands = 0 : i64, tpu.core_type = #tpu.core_type<tc>, window_params = [{transform_indices = @transform_0, window_bounds = array<i64: 128, 128>}, {pipeline_mode = #tpu.pipeline_mode<synchronous>, transform_indices = @transform_1, window_bounds = array<i64: 128, 128>}, {pipeline_mode = #tpu.pipeline_mode<synchronous>, transform_indices = @transform_2, window_bounds = array<i64: 1, 128>}, {transform_indices = @transform_3, window_bounds = array<i64: 128, 128>}]} {
    %c0 = arith.constant 0 : index
    %c0_0 = arith.constant 0 : index
    %0 = vector.load %arg1[%c0, %c0_0] : memref<128x128xf32, #tpu.memory_space<vmem>>, vector<128x128xf32>
    %c0_1 = arith.constant 0 : index
    %c0_2 = arith.constant 0 : index
    %1 = vector.load %arg2[%c0_1, %c0_2] : memref<128x128xf32, #tpu.memory_space<vmem>>, vector<128x128xf32>
    %cst = arith.constant dense<0.000000e+00> : vector<128x128xf32>
    %2 = tpu.matmul %0, %1, %cst {dimension_numbers = #tpu.dot_dimension_numbers<[1], [0], [0], [1], [0, 0, 1, 1], [], []>} : vector<128x128xf32>, vector<128x128xf32>, vector<128x128xf32> -> vector<128x128xf32>
    %c0_3 = arith.constant 0 : index
    %c0_4 = arith.constant 0 : index
    %3 = vector.load %arg3[%c0_3, %c0_4] : memref<1x128xf32, #tpu.memory_space<vmem>>, vector<1x128xf32>
    %4 = vector.broadcast %3 : vector<1x128xf32> to vector<128x128xf32>
    %5 = arith.addf %2, %4 : vector<128x128xf32>
    %cst_5 = arith.constant 0.000000e+00 : f32
    %6 = vector.broadcast %cst_5 : f32 to vector<128x128xf32>
    %7 = arith.maximumf %5, %6 : vector<128x128xf32>
    %c0_6 = arith.constant 0 : index
    %c0_7 = arith.constant 0 : index
    %8 = vector.load %arg4[%c0_6, %c0_7] : memref<128x128xf32, #tpu.memory_space<vmem>>, vector<128x128xf32>
    tpu.vector_store %arg4[%c0_6, %c0_7], %7 {strides = array<i32>} : memref<128x128xf32, #tpu.memory_space<vmem>>, vector<128x128xf32>,
    return
  }
  func.func @transform_0(%arg0: i32) -> (i32, i32) {
    %c0_i32 = arith.constant 0 : i32
    %c0_i32_0 = arith.constant 0 : i32
    return %arg0, %c0_i32 : i32, i32
  }
  func.func @transform_1(%arg0: i32) -> (i32, i32) {
    %c0_i32 = arith.constant 0 : i32
    %c0_i32_0 = arith.constant 0 : i32
    %c0_i32_1 = arith.constant 0 : i32
    return %c0_i32, %c0_i32_0 : i32, i32
  }
  func.func @transform_2(%arg0: i32) -> (i32, i32) {
    %c0_i32 = arith.constant 0 : i32
    %c0_i32_0 = arith.constant 0 : i32
    %c0_i32_1 = arith.constant 0 : i32
    return %c0_i32, %c0_i32_0 : i32, i32
  }
  func.func @transform_3(%arg0: i32) -> (i32, i32) {
    %c0_i32 = arith.constant 0 : i32
    %c0_i32_0 = arith.constant 0 : i32
    return %arg0, %c0_i32 : i32, i32
  }
}

module attributes {stable_mosaic.version = 11 : i64} {
  func.func @_fused_matmul_kernel(%arg0: i32, %arg1: memref<32x256xf32, #tpu.memory_space<vmem>>, %arg2: memref<256x128xf32, #tpu.memory_space<vmem>>, %arg3: memref<1x128xf32, #tpu.memory_space<vmem>>, %arg4: memref<32x128xf32, #tpu.memory_space<vmem>>) attributes {dimension_semantics = [#tpu.dimension_semantics<parallel>], iteration_bounds = array<i64: 1>, scalar_prefetch = 0 : i64, scratch_operands = 0 : i64, tpu.core_type = #tpu.core_type<tc>, window_params = [{transform_indices = @transform_0, window_bounds = array<i64: 32, 256>}, {pipeline_mode = #tpu.pipeline_mode<synchronous>, transform_indices = @transform_1, window_bounds = array<i64: 256, 128>}, {pipeline_mode = #tpu.pipeline_mode<synchronous>, transform_indices = @transform_2, window_bounds = array<i64: 1, 128>}, {transform_indices = @transform_3, window_bounds = array<i64: 32, 128>}]} {
    %c0 = arith.constant 0 : index
    %c0_0 = arith.constant 0 : index
    %0 = vector.load %arg1[%c0, %c0_0] : memref<32x256xf32, #tpu.memory_space<vmem>>, vector<32x256xf32>
    %c0_1 = arith.constant 0 : index
    %c0_2 = arith.constant 0 : index
    %1 = vector.load %arg2[%c0_1, %c0_2] : memref<256x128xf32, #tpu.memory_space<vmem>>, vector<256x128xf32>
    %cst = arith.constant dense<0.000000e+00> : vector<32x128xf32>
    %2 = tpu.matmul %0, %1, %cst {dimension_numbers = #tpu.dot_dimension_numbers<[1], [0], [0], [1], [0, 0, 1, 1], [], []>} : vector<32x256xf32>, vector<256x128xf32>, vector<32x128xf32> -> vector<32x128xf32>
    %c0_3 = arith.constant 0 : index
    %c0_4 = arith.constant 0 : index
    %3 = vector.load %arg3[%c0_3, %c0_4] : memref<1x128xf32, #tpu.memory_space<vmem>>, vector<1x128xf32>
    %4 = vector.broadcast %3 : vector<1x128xf32> to vector<32x128xf32>
    %5 = arith.addf %2, %4 : vector<32x128xf32>
    %cst_5 = arith.constant 0.000000e+00 : f32
    %6 = vector.broadcast %cst_5 : f32 to vector<32x128xf32>
    %7 = arith.maximumf %5, %6 : vector<32x128xf32>
    %c0_6 = arith.constant 0 : index
    %c0_7 = arith.constant 0 : index
    %8 = vector.load %arg4[%c0_6, %c0_7] : memref<32x128xf32, #tpu.memory_space<vmem>>, vector<32x128xf32>
    tpu.vector_store %arg4[%c0_6, %c0_7], %7 {strides = array<i32>} : memref<32x128xf32, #tpu.memory_space<vmem>>, vector<32x128xf32>,
    return
  }
  func.func @transform_0(%arg0: i32) -> (i32, i32) {
    %c0_i32 = arith.constant 0 : i32
    %c0_i32_0 = arith.constant 0 : i32
    return %arg0, %c0_i32 : i32, i32
  }
  func.func @transform_1(%arg0: i32) -> (i32, i32) {
    %c0_i32 = arith.constant 0 : i32
    %c0_i32_0 = arith.constant 0 : i32
    %c0_i32_1 = arith.constant 0 : i32
    return %c0_i32, %c0_i32_0 : i32, i32
  }
  func.func @transform_2(%arg0: i32) -> (i32, i32) {
    %c0_i32 = arith.constant 0 : i32
    %c0_i32_0 = arith.constant 0 : i32
    %c0_i32_1 = arith.constant 0 : i32
    return %c0_i32, %c0_i32_0 : i32, i32
  }
  func.func @transform_3(%arg0: i32) -> (i32, i32) {
    %c0_i32 = arith.constant 0 : i32
    %c0_i32_0 = arith.constant 0 : i32
    return %arg0, %c0_i32 : i32, i32
  }
}

module attributes {stable_mosaic.version = 11 : i64} {
  func.func @_fused_matmul_kernel(%arg0: i32, %arg1: memref<8x384xf32, #tpu.memory_space<vmem>>, %arg2: memref<384x128xf32, #tpu.memory_space<vmem>>, %arg3: memref<1x128xf32, #tpu.memory_space<vmem>>, %arg4: memref<8x128xf32, #tpu.memory_space<vmem>>) attributes {dimension_semantics = [#tpu.dimension_semantics<parallel>], iteration_bounds = array<i64: 1>, scalar_prefetch = 0 : i64, scratch_operands = 0 : i64, tpu.core_type = #tpu.core_type<tc>, window_params = [{transform_indices = @transform_0, window_bounds = array<i64: 8, 384>}, {pipeline_mode = #tpu.pipeline_mode<synchronous>, transform_indices = @transform_1, window_bounds = array<i64: 384, 128>}, {pipeline_mode = #tpu.pipeline_mode<synchronous>, transform_indices = @transform_2, window_bounds = array<i64: 1, 128>}, {transform_indices = @transform_3, window_bounds = array<i64: 8, 128>}]} {
    %c0 = arith.constant 0 : index
    %c0_0 = arith.constant 0 : index
    %0 = vector.load %arg1[%c0, %c0_0] : memref<8x384xf32, #tpu.memory_space<vmem>>, vector<8x384xf32>
    %c0_1 = arith.constant 0 : index
    %c0_2 = arith.constant 0 : index
    %1 = vector.load %arg2[%c0_1, %c0_2] : memref<384x128xf32, #tpu.memory_space<vmem>>, vector<384x128xf32>
    %cst = arith.constant dense<0.000000e+00> : vector<8x128xf32>
    %2 = tpu.matmul %0, %1, %cst {dimension_numbers = #tpu.dot_dimension_numbers<[1], [0], [0], [1], [0, 0, 1, 1], [], []>} : vector<8x384xf32>, vector<384x128xf32>, vector<8x128xf32> -> vector<8x128xf32>
    %c0_3 = arith.constant 0 : index
    %c0_4 = arith.constant 0 : index
    %3 = vector.load %arg3[%c0_3, %c0_4] : memref<1x128xf32, #tpu.memory_space<vmem>>, vector<1x128xf32>
    %4 = vector.broadcast %3 : vector<1x128xf32> to vector<8x128xf32>
    %5 = arith.addf %2, %4 : vector<8x128xf32>
    %cst_5 = arith.constant 0.000000e+00 : f32
    %6 = vector.broadcast %cst_5 : f32 to vector<8x128xf32>
    %7 = arith.maximumf %5, %6 : vector<8x128xf32>
    %c0_6 = arith.constant 0 : index
    %c0_7 = arith.constant 0 : index
    %8 = vector.load %arg4[%c0_6, %c0_7] : memref<8x128xf32, #tpu.memory_space<vmem>>, vector<8x128xf32>
    tpu.vector_store %arg4[%c0_6, %c0_7], %7 {strides = array<i32>} : memref<8x128xf32, #tpu.memory_space<vmem>>, vector<8x128xf32>,
    return
  }
  func.func @transform_0(%arg0: i32) -> (i32, i32) {
    %c0_i32 = arith.constant 0 : i32
    %c0_i32_0 = arith.constant 0 : i32
    return %arg0, %c0_i32 : i32, i32
  }
  func.func @transform_1(%arg0: i32) -> (i32, i32) {
    %c0_i32 = arith.constant 0 : i32
    %c0_i32_0 = arith.constant 0 : i32
    %c0_i32_1 = arith.constant 0 : i32
    return %c0_i32, %c0_i32_0 : i32, i32
  }
  func.func @transform_2(%arg0: i32) -> (i32, i32) {
    %c0_i32 = arith.constant 0 : i32
    %c0_i32_0 = arith.constant 0 : i32
    %c0_i32_1 = arith.constant 0 : i32
    return %c0_i32, %c0_i32_0 : i32, i32
  }
  func.func @transform_3(%arg0: i32) -> (i32, i32) {
    %c0_i32 = arith.constant 0 : i32
    %c0_i32_0 = arith.constant 0 : i32
    return %arg0, %c0_i32 : i32, i32
  }
}

module attributes {stable_mosaic.version = 11 : i64} {
  func.func @_fused_matmul_kernel(%arg0: i32, %arg1: memref<8x640xf32, #tpu.memory_space<vmem>>, %arg2: memref<640x128xf32, #tpu.memory_space<vmem>>, %arg3: memref<1x128xf32, #tpu.memory_space<vmem>>, %arg4: memref<8x128xf32, #tpu.memory_space<vmem>>) attributes {dimension_semantics = [#tpu.dimension_semantics<parallel>], iteration_bounds = array<i64: 1>, scalar_prefetch = 0 : i64, scratch_operands = 0 : i64, tpu.core_type = #tpu.core_type<tc>, window_params = [{transform_indices = @transform_0, window_bounds = array<i64: 8, 640>}, {pipeline_mode = #tpu.pipeline_mode<synchronous>, transform_indices = @transform_1, window_bounds = array<i64: 640, 128>}, {pipeline_mode = #tpu.pipeline_mode<synchronous>, transform_indices = @transform_2, window_bounds = array<i64: 1, 128>}, {transform_indices = @transform_3, window_bounds = array<i64: 8, 128>}]} {
    %c0 = arith.constant 0 : index
    %c0_0 = arith.constant 0 : index
    %0 = vector.load %arg1[%c0, %c0_0] : memref<8x640xf32, #tpu.memory_space<vmem>>, vector<8x640xf32>
    %c0_1 = arith.constant 0 : index
    %c0_2 = arith.constant 0 : index
    %1 = vector.load %arg2[%c0_1, %c0_2] : memref<640x128xf32, #tpu.memory_space<vmem>>, vector<640x128xf32>
    %cst = arith.constant dense<0.000000e+00> : vector<8x128xf32>
    %2 = tpu.matmul %0, %1, %cst {dimension_numbers = #tpu.dot_dimension_numbers<[1], [0], [0], [1], [0, 0, 1, 1], [], []>} : vector<8x640xf32>, vector<640x128xf32>, vector<8x128xf32> -> vector<8x128xf32>
    %c0_3 = arith.constant 0 : index
    %c0_4 = arith.constant 0 : index
    %3 = vector.load %arg3[%c0_3, %c0_4] : memref<1x128xf32, #tpu.memory_space<vmem>>, vector<1x128xf32>
    %4 = vector.broadcast %3 : vector<1x128xf32> to vector<8x128xf32>
    %5 = arith.addf %2, %4 : vector<8x128xf32>
    %cst_5 = arith.constant 0.000000e+00 : f32
    %6 = vector.broadcast %cst_5 : f32 to vector<8x128xf32>
    %7 = arith.maximumf %5, %6 : vector<8x128xf32>
    %c0_6 = arith.constant 0 : index
    %c0_7 = arith.constant 0 : index
    %8 = vector.load %arg4[%c0_6, %c0_7] : memref<8x128xf32, #tpu.memory_space<vmem>>, vector<8x128xf32>
    tpu.vector_store %arg4[%c0_6, %c0_7], %7 {strides = array<i32>} : memref<8x128xf32, #tpu.memory_space<vmem>>, vector<8x128xf32>,
    return
  }
  func.func @transform_0(%arg0: i32) -> (i32, i32) {
    %c0_i32 = arith.constant 0 : i32
    %c0_i32_0 = arith.constant 0 : i32
    return %arg0, %c0_i32 : i32, i32
  }
  func.func @transform_1(%arg0: i32) -> (i32, i32) {
    %c0_i32 = arith.constant 0 : i32
    %c0_i32_0 = arith.constant 0 : i32
    %c0_i32_1 = arith.constant 0 : i32
    return %c0_i32, %c0_i32_0 : i32, i32
  }
  func.func @transform_2(%arg0: i32) -> (i32, i32) {
    %c0_i32 = arith.constant 0 : i32
    %c0_i32_0 = arith.constant 0 : i32
    %c0_i32_1 = arith.constant 0 : i32
    return %c0_i32, %c0_i32_0 : i32, i32
  }
  func.func @transform_3(%arg0: i32) -> (i32, i32) {
    %c0_i32 = arith.constant 0 : i32
    %c0_i32_0 = arith.constant 0 : i32
    return %arg0, %c0_i32 : i32, i32
  }
}

module attributes {stable_mosaic.version = 11 : i64} {
  func.func @_fused_matmul_kernel(%arg0: i32, %arg1: memref<8x512xf32, #tpu.memory_space<vmem>>, %arg2: memref<512x256xf32, #tpu.memory_space<vmem>>, %arg3: memref<1x256xf32, #tpu.memory_space<vmem>>, %arg4: memref<8x256xf32, #tpu.memory_space<vmem>>) attributes {dimension_semantics = [#tpu.dimension_semantics<parallel>], iteration_bounds = array<i64: 1>, scalar_prefetch = 0 : i64, scratch_operands = 0 : i64, tpu.core_type = #tpu.core_type<tc>, window_params = [{transform_indices = @transform_0, window_bounds = array<i64: 8, 512>}, {pipeline_mode = #tpu.pipeline_mode<synchronous>, transform_indices = @transform_1, window_bounds = array<i64: 512, 256>}, {pipeline_mode = #tpu.pipeline_mode<synchronous>, transform_indices = @transform_2, window_bounds = array<i64: 1, 256>}, {transform_indices = @transform_3, window_bounds = array<i64: 8, 256>}]} {
    %c0 = arith.constant 0 : index
    %c0_0 = arith.constant 0 : index
    %0 = vector.load %arg1[%c0, %c0_0] : memref<8x512xf32, #tpu.memory_space<vmem>>, vector<8x512xf32>
    %c0_1 = arith.constant 0 : index
    %c0_2 = arith.constant 0 : index
    %1 = vector.load %arg2[%c0_1, %c0_2] : memref<512x256xf32, #tpu.memory_space<vmem>>, vector<512x256xf32>
    %cst = arith.constant dense<0.000000e+00> : vector<8x256xf32>
    %2 = tpu.matmul %0, %1, %cst {dimension_numbers = #tpu.dot_dimension_numbers<[1], [0], [0], [1], [0, 0, 1, 1], [], []>} : vector<8x512xf32>, vector<512x256xf32>, vector<8x256xf32> -> vector<8x256xf32>
    %c0_3 = arith.constant 0 : index
    %c0_4 = arith.constant 0 : index
    %3 = vector.load %arg3[%c0_3, %c0_4] : memref<1x256xf32, #tpu.memory_space<vmem>>, vector<1x256xf32>
    %4 = vector.broadcast %3 : vector<1x256xf32> to vector<8x256xf32>
    %5 = arith.addf %2, %4 : vector<8x256xf32>
    %cst_5 = arith.constant 0.000000e+00 : f32
    %6 = vector.broadcast %cst_5 : f32 to vector<8x256xf32>
    %7 = arith.maximumf %5, %6 : vector<8x256xf32>
    %c0_6 = arith.constant 0 : index
    %c0_7 = arith.constant 0 : index
    %8 = vector.load %arg4[%c0_6, %c0_7] : memref<8x256xf32, #tpu.memory_space<vmem>>, vector<8x256xf32>
    tpu.vector_store %arg4[%c0_6, %c0_7], %7 {strides = array<i32>} : memref<8x256xf32, #tpu.memory_space<vmem>>, vector<8x256xf32>,
    return
  }
  func.func @transform_0(%arg0: i32) -> (i32, i32) {
    %c0_i32 = arith.constant 0 : i32
    %c0_i32_0 = arith.constant 0 : i32
    return %arg0, %c0_i32 : i32, i32
  }
  func.func @transform_1(%arg0: i32) -> (i32, i32) {
    %c0_i32 = arith.constant 0 : i32
    %c0_i32_0 = arith.constant 0 : i32
    %c0_i32_1 = arith.constant 0 : i32
    return %c0_i32, %c0_i32_0 : i32, i32
  }
  func.func @transform_2(%arg0: i32) -> (i32, i32) {
    %c0_i32 = arith.constant 0 : i32
    %c0_i32_0 = arith.constant 0 : i32
    %c0_i32_1 = arith.constant 0 : i32
    return %c0_i32, %c0_i32_0 : i32, i32
  }
  func.func @transform_3(%arg0: i32) -> (i32, i32) {
    %c0_i32 = arith.constant 0 : i32
    %c0_i32_0 = arith.constant 0 : i32
    return %arg0, %c0_i32 : i32, i32
  }
}

module attributes {stable_mosaic.version = 11 : i64} {
  func.func @_fused_matmul_kernel(%arg0: i32, %arg1: memref<8x256xf32, #tpu.memory_space<vmem>>, %arg2: memref<256x128xf32, #tpu.memory_space<vmem>>, %arg3: memref<1x128xf32, #tpu.memory_space<vmem>>, %arg4: memref<8x128xf32, #tpu.memory_space<vmem>>) attributes {dimension_semantics = [#tpu.dimension_semantics<parallel>], iteration_bounds = array<i64: 1>, scalar_prefetch = 0 : i64, scratch_operands = 0 : i64, tpu.core_type = #tpu.core_type<tc>, window_params = [{transform_indices = @transform_0, window_bounds = array<i64: 8, 256>}, {pipeline_mode = #tpu.pipeline_mode<synchronous>, transform_indices = @transform_1, window_bounds = array<i64: 256, 128>}, {pipeline_mode = #tpu.pipeline_mode<synchronous>, transform_indices = @transform_2, window_bounds = array<i64: 1, 128>}, {transform_indices = @transform_3, window_bounds = array<i64: 8, 128>}]} {
    %c0 = arith.constant 0 : index
    %c0_0 = arith.constant 0 : index
    %0 = vector.load %arg1[%c0, %c0_0] : memref<8x256xf32, #tpu.memory_space<vmem>>, vector<8x256xf32>
    %c0_1 = arith.constant 0 : index
    %c0_2 = arith.constant 0 : index
    %1 = vector.load %arg2[%c0_1, %c0_2] : memref<256x128xf32, #tpu.memory_space<vmem>>, vector<256x128xf32>
    %cst = arith.constant dense<0.000000e+00> : vector<8x128xf32>
    %2 = tpu.matmul %0, %1, %cst {dimension_numbers = #tpu.dot_dimension_numbers<[1], [0], [0], [1], [0, 0, 1, 1], [], []>} : vector<8x256xf32>, vector<256x128xf32>, vector<8x128xf32> -> vector<8x128xf32>
    %c0_3 = arith.constant 0 : index
    %c0_4 = arith.constant 0 : index
    %3 = vector.load %arg3[%c0_3, %c0_4] : memref<1x128xf32, #tpu.memory_space<vmem>>, vector<1x128xf32>
    %4 = vector.broadcast %3 : vector<1x128xf32> to vector<8x128xf32>
    %5 = arith.addf %2, %4 : vector<8x128xf32>
    %cst_5 = arith.constant 0.000000e+00 : f32
    %6 = vector.broadcast %cst_5 : f32 to vector<8x128xf32>
    %7 = arith.maximumf %5, %6 : vector<8x128xf32>
    %c0_6 = arith.constant 0 : index
    %c0_7 = arith.constant 0 : index
    %8 = vector.load %arg4[%c0_6, %c0_7] : memref<8x128xf32, #tpu.memory_space<vmem>>, vector<8x128xf32>
    tpu.vector_store %arg4[%c0_6, %c0_7], %7 {strides = array<i32>} : memref<8x128xf32, #tpu.memory_space<vmem>>, vector<8x128xf32>,
    return
  }
  func.func @transform_0(%arg0: i32) -> (i32, i32) {
    %c0_i32 = arith.constant 0 : i32
    %c0_i32_0 = arith.constant 0 : i32
    return %arg0, %c0_i32 : i32, i32
  }
  func.func @transform_1(%arg0: i32) -> (i32, i32) {
    %c0_i32 = arith.constant 0 : i32
    %c0_i32_0 = arith.constant 0 : i32
    %c0_i32_1 = arith.constant 0 : i32
    return %c0_i32, %c0_i32_0 : i32, i32
  }
  func.func @transform_2(%arg0: i32) -> (i32, i32) {
    %c0_i32 = arith.constant 0 : i32
    %c0_i32_0 = arith.constant 0 : i32
    %c0_i32_1 = arith.constant 0 : i32
    return %c0_i32, %c0_i32_0 : i32, i32
  }
  func.func @transform_3(%arg0: i32) -> (i32, i32) {
    %c0_i32 = arith.constant 0 : i32
    %c0_i32_0 = arith.constant 0 : i32
    return %arg0, %c0_i32 : i32, i32
  }
}

module attributes {stable_mosaic.version = 11 : i64} {
  func.func @_fused_matmul_kernel(%arg0: i32, %arg1: memref<32x128xf32, #tpu.memory_space<vmem>>, %arg2: memref<128x128xf32, #tpu.memory_space<vmem>>, %arg3: memref<1x128xf32, #tpu.memory_space<vmem>>, %arg4: memref<32x128xf32, #tpu.memory_space<vmem>>) attributes {dimension_semantics = [#tpu.dimension_semantics<parallel>], iteration_bounds = array<i64: 1>, scalar_prefetch = 0 : i64, scratch_operands = 0 : i64, tpu.core_type = #tpu.core_type<tc>, window_params = [{transform_indices = @transform_0, window_bounds = array<i64: 32, 128>}, {pipeline_mode = #tpu.pipeline_mode<synchronous>, transform_indices = @transform_1, window_bounds = array<i64: 128, 128>}, {pipeline_mode = #tpu.pipeline_mode<synchronous>, transform_indices = @transform_2, window_bounds = array<i64: 1, 128>}, {transform_indices = @transform_3, window_bounds = array<i64: 32, 128>}]} {
    %c0 = arith.constant 0 : index
    %c0_0 = arith.constant 0 : index
    %0 = vector.load %arg1[%c0, %c0_0] : memref<32x128xf32, #tpu.memory_space<vmem>>, vector<32x128xf32>
    %c0_1 = arith.constant 0 : index
    %c0_2 = arith.constant 0 : index
    %1 = vector.load %arg2[%c0_1, %c0_2] : memref<128x128xf32, #tpu.memory_space<vmem>>, vector<128x128xf32>
    %cst = arith.constant dense<0.000000e+00> : vector<32x128xf32>
    %2 = tpu.matmul %0, %1, %cst {dimension_numbers = #tpu.dot_dimension_numbers<[1], [0], [0], [1], [0, 0, 1, 1], [], []>} : vector<32x128xf32>, vector<128x128xf32>, vector<32x128xf32> -> vector<32x128xf32>
    %c0_3 = arith.constant 0 : index
    %c0_4 = arith.constant 0 : index
    %3 = vector.load %arg3[%c0_3, %c0_4] : memref<1x128xf32, #tpu.memory_space<vmem>>, vector<1x128xf32>
    %4 = vector.broadcast %3 : vector<1x128xf32> to vector<32x128xf32>
    %5 = arith.addf %2, %4 : vector<32x128xf32>
    %cst_5 = arith.constant 0.000000e+00 : f32
    %6 = vector.broadcast %cst_5 : f32 to vector<32x128xf32>
    %7 = arith.maximumf %5, %6 : vector<32x128xf32>
    %c0_6 = arith.constant 0 : index
    %c0_7 = arith.constant 0 : index
    %8 = vector.load %arg4[%c0_6, %c0_7] : memref<32x128xf32, #tpu.memory_space<vmem>>, vector<32x128xf32>
    tpu.vector_store %arg4[%c0_6, %c0_7], %7 {strides = array<i32>} : memref<32x128xf32, #tpu.memory_space<vmem>>, vector<32x128xf32>,
    return
  }
  func.func @transform_0(%arg0: i32) -> (i32, i32) {
    %c0_i32 = arith.constant 0 : i32
    %c0_i32_0 = arith.constant 0 : i32
    return %arg0, %c0_i32 : i32, i32
  }
  func.func @transform_1(%arg0: i32) -> (i32, i32) {
    %c0_i32 = arith.constant 0 : i32
    %c0_i32_0 = arith.constant 0 : i32
    %c0_i32_1 = arith.constant 0 : i32
    return %c0_i32, %c0_i32_0 : i32, i32
  }
  func.func @transform_2(%arg0: i32) -> (i32, i32) {
    %c0_i32 = arith.constant 0 : i32
    %c0_i32_0 = arith.constant 0 : i32
    %c0_i32_1 = arith.constant 0 : i32
    return %c0_i32, %c0_i32_0 : i32, i32
  }
  func.func @transform_3(%arg0: i32) -> (i32, i32) {
    %c0_i32 = arith.constant 0 : i32
    %c0_i32_0 = arith.constant 0 : i32
    return %arg0, %c0_i32 : i32, i32
  }
}

module attributes {stable_mosaic.version = 11 : i64} {
  func.func @_fused_matmul_kernel(%arg0: i32, %arg1: memref<128x128xf32, #tpu.memory_space<vmem>>, %arg2: memref<128x128xf32, #tpu.memory_space<vmem>>, %arg3: memref<1x128xf32, #tpu.memory_space<vmem>>, %arg4: memref<128x128xf32, #tpu.memory_space<vmem>>) attributes {dimension_semantics = [#tpu.dimension_semantics<parallel>], iteration_bounds = array<i64: 1>, scalar_prefetch = 0 : i64, scratch_operands = 0 : i64, tpu.core_type = #tpu.core_type<tc>, window_params = [{transform_indices = @transform_0, window_bounds = array<i64: 128, 128>}, {pipeline_mode = #tpu.pipeline_mode<synchronous>, transform_indices = @transform_1, window_bounds = array<i64: 128, 128>}, {pipeline_mode = #tpu.pipeline_mode<synchronous>, transform_indices = @transform_2, window_bounds = array<i64: 1, 128>}, {transform_indices = @transform_3, window_bounds = array<i64: 128, 128>}]} {
    %c0 = arith.constant 0 : index
    %c0_0 = arith.constant 0 : index
    %0 = vector.load %arg1[%c0, %c0_0] : memref<128x128xf32, #tpu.memory_space<vmem>>, vector<128x128xf32>
    %c0_1 = arith.constant 0 : index
    %c0_2 = arith.constant 0 : index
    %1 = vector.load %arg2[%c0_1, %c0_2] : memref<128x128xf32, #tpu.memory_space<vmem>>, vector<128x128xf32>
    %cst = arith.constant dense<0.000000e+00> : vector<128x128xf32>
    %2 = tpu.matmul %0, %1, %cst {dimension_numbers = #tpu.dot_dimension_numbers<[1], [0], [0], [1], [0, 0, 1, 1], [], []>} : vector<128x128xf32>, vector<128x128xf32>, vector<128x128xf32> -> vector<128x128xf32>
    %c0_3 = arith.constant 0 : index
    %c0_4 = arith.constant 0 : index
    %3 = vector.load %arg3[%c0_3, %c0_4] : memref<1x128xf32, #tpu.memory_space<vmem>>, vector<1x128xf32>
    %4 = vector.broadcast %3 : vector<1x128xf32> to vector<128x128xf32>
    %5 = arith.addf %2, %4 : vector<128x128xf32>
    %cst_5 = arith.constant 5.000000e-01 : f32
    %6 = vector.broadcast %cst_5 : f32 to vector<128x128xf32>
    %7 = arith.mulf %5, %6 : vector<128x128xf32>
    %8 = math.tanh %7 : vector<128x128xf32>
    %cst_6 = arith.constant 1.000000e+00 : f32
    %9 = vector.broadcast %cst_6 : f32 to vector<128x128xf32>
    %10 = arith.addf %8, %9 : vector<128x128xf32>
    %cst_7 = arith.constant 5.000000e-01 : f32
    %11 = vector.broadcast %cst_7 : f32 to vector<128x128xf32>
    %12 = arith.mulf %11, %10 : vector<128x128xf32>
    %c0_8 = arith.constant 0 : index
    %c0_9 = arith.constant 0 : index
    %13 = vector.load %arg4[%c0_8, %c0_9] : memref<128x128xf32, #tpu.memory_space<vmem>>, vector<128x128xf32>
    tpu.vector_store %arg4[%c0_8, %c0_9], %12 {strides = array<i32>} : memref<128x128xf32, #tpu.memory_space<vmem>>, vector<128x128xf32>,
    return
  }
  func.func @transform_0(%arg0: i32) -> (i32, i32) {
    %c0_i32 = arith.constant 0 : i32
    %c0_i32_0 = arith.constant 0 : i32
    return %arg0, %c0_i32 : i32, i32
  }
  func.func @transform_1(%arg0: i32) -> (i32, i32) {
    %c0_i32 = arith.constant 0 : i32
    %c0_i32_0 = arith.constant 0 : i32
    %c0_i32_1 = arith.constant 0 : i32
    return %c0_i32, %c0_i32_0 : i32, i32
  }
  func.func @transform_2(%arg0: i32) -> (i32, i32) {
    %c0_i32 = arith.constant 0 : i32
    %c0_i32_0 = arith.constant 0 : i32
    %c0_i32_1 = arith.constant 0 : i32
    return %c0_i32, %c0_i32_0 : i32, i32
  }
  func.func @transform_3(%arg0: i32) -> (i32, i32) {
    %c0_i32 = arith.constant 0 : i32
    %c0_i32_0 = arith.constant 0 : i32
    return %arg0, %c0_i32 : i32, i32
  }
}

</mosaic_0001>

<bundles_post_ra>
// kernel: autoencoder_forward.8
= control target key start
LH: loop header
LB: loop body
LE: loop exit
PB: predicated region body
PF: predicated region fallthrough
CT: control target
= control target key end

     0   :  { %s367_s1 = inlined_call_operand.vmem [shape: f32[128,128], index: 1, kind: input, shape index: {}]   ;;  %s368_s2 = inlined_call_operand.vmem [shape: f32[1,128], index: 2, kind: input, shape index: {}]   ;;  %s369_s0 = inlined_call_operand.vmem [shape: f32[128,128], index: 0, kind: input, shape index: {}]   ;;  %s370_s3 = inlined_call_operand.vmem [shape: f32[128,128], index: 3, kind: output, shape index: {}]  }
   0x1   :  { %v45_v0 = vld [vmem:[%s367_s1 + $0x78] sm:$0xff]  ;;  %v44_v1 = vld [vmem:[%s367_s1 + $0x70] sm:$0xff]  ;;  %v43_v2 = vld [vmem:[%s367_s1 + $0x68] sm:$0xff] }
   0x2   :  { %152 = vmatpush.msra.mxu2 %v45_v0  ;;  %153 = vmatpush.msra.mxu3 %v45_v0  ;;  %v42_v3 = vld [vmem:[%s367_s1 + $0x60] sm:$0xff]  ;;  %v41_v4 = vld [vmem:[%s367_s1 + $0x58] sm:$0xff]  ;;  %v40_v5 = vld [vmem:[%s367_s1 + $0x50] sm:$0xff] }
   0x3   :  { %50 = vmatpush.msra.mxu0 %v45_v0  ;;  %151 = vmatpush.msra.mxu1 %v45_v0  ;;  %v39_v6 = vld [vmem:[%s367_s1 + $0x48] sm:$0xff]  ;;  %v38_v7 = vld [vmem:[%s367_s1 + $0x40] sm:$0xff]  ;;  %v37_v8 = vld [vmem:[%s367_s1 + $0x38] sm:$0xff] }
   0x4   :  { %155 = vmatpush.msra.mxu2 %v44_v1  ;;  %156 = vmatpush.msra.mxu3 %v44_v1  ;;  %v36_v9 = vld [vmem:[%s367_s1 + $0x30] sm:$0xff]  ;;  %v35_v10 = vld [vmem:[%s367_s1 + $0x28] sm:$0xff]  ;;  %v34_v11 = vld [vmem:[%s367_s1 + $0x20] sm:$0xff] }
   0x5   :  { %51 = vmatpush.msra.mxu0 %v44_v1  ;;  %154 = vmatpush.msra.mxu1 %v44_v1  ;;  %v33_v12 = vld [vmem:[%s367_s1 + $0x18] sm:$0xff]  ;;  %v32_v13 = vld [vmem:[%s367_s1 + $0x10] sm:$0xff]  ;;  %v31_v14 = vld [vmem:[%s367_s1 + $0x8] sm:$0xff] }
   0x6   :  { %158 = vmatpush.msra.mxu2 %v43_v2  ;;  %159 = vmatpush.msra.mxu3 %v43_v2  ;;  %v30_v15 = vld [vmem:[%s367_s1] sm:$0xff]  ;;  %v23_v20 = vld [vmem:[%s369_s0 + $0x48] sm:$0xff]  ;;  %v24_v24 = vld [vmem:[%s369_s0 + $0x50] sm:$0xff] }
   0x7   :  { %52 = vmatpush.msra.mxu0 %v43_v2  ;;  %157 = vmatpush.msra.mxu1 %v43_v2  ;;  %v22_v16 = vld [vmem:[%s369_s0 + $0x40] sm:$0xff]  ;;  %v27_v21 = vld [vmem:[%s369_s0 + $0x68] sm:$0xff]  ;;  %v28_v25 = vld [vmem:[%s369_s0 + $0x70] sm:$0xff] }
   0x8   :  { %161 = vmatpush.msra.mxu2 %v42_v3  ;;  %162 = vmatpush.msra.mxu3 %v42_v3  ;;  %v26_v17 = vld [vmem:[%s369_s0 + $0x60] sm:$0xff]  ;;  %v15_v22 = vld [vmem:[%s369_s0 + $0x8] sm:$0xff]  ;;  %v16_v26 = vld [vmem:[%s369_s0 + $0x10] sm:$0xff] }
   0x9   :  { %53 = vmatpush.msra.mxu0 %v42_v3  ;;  %160 = vmatpush.msra.mxu1 %v42_v3  ;;  %v14_v18 = vld [vmem:[%s369_s0] sm:$0xff]  ;;  %v19_v23 = vld [vmem:[%s369_s0 + $0x28] sm:$0xff]  ;;  %v20_v27 = vld [vmem:[%s369_s0 + $0x30] sm:$0xff] }
   0xa   :  { %164 = vmatpush.msra.mxu2 %v41_v4  ;;  %165 = vmatpush.msra.mxu3 %v41_v4  ;;  %v18_v19 = vld [vmem:[%s369_s0 + $0x20] sm:$0xff]  ;;  %v25_v28 = vld [vmem:[%s369_s0 + $0x58] sm:$0xff] }
   0xb   :  { %54 = vmatpush.msra.mxu0 %v41_v4  ;;  %163 = vmatpush.msra.mxu1 %v41_v4  ;;  %v29_v29 = vld [vmem:[%s369_s0 + $0x78] sm:$0xff]  ;;  %v199_v32 = vld [vmem:[%s368_s2] ss:$0 sm:$0xff] }
   0xc   :  { %167 = vmatpush.msra.mxu2 %v40_v5  ;;  %168 = vmatpush.msra.mxu3 %v40_v5  ;;  %v17_v30 = vld [vmem:[%s369_s0 + $0x18] sm:$0xff] }
   0xd   :  { %55 = vmatpush.msra.mxu0 %v40_v5  ;;  %166 = vmatpush.msra.mxu1 %v40_v5  ;;  %v21_v31 = vld [vmem:[%s369_s0 + $0x38] sm:$0xff] }
   0xe   :  { %170 = vmatpush.msra.mxu2 %v39_v6  ;;  %171 = vmatpush.msra.mxu3 %v39_v6 }
   0xf   :  { %56 = vmatpush.msra.mxu0 %v39_v6  ;;  %169 = vmatpush.msra.mxu1 %v39_v6 }
  0x10   :  { %173 = vmatpush.msra.mxu2 %v38_v7  ;;  %174 = vmatpush.msra.mxu3 %v38_v7 }
  0x11   :  { %57 = vmatpush.msra.mxu0 %v38_v7  ;;  %172 = vmatpush.msra.mxu1 %v38_v7 }
  0x12   :  { %176 = vmatpush.msra.mxu2 %v37_v8  ;;  %177 = vmatpush.msra.mxu3 %v37_v8 }
  0x13   :  { %58 = vmatpush.msra.mxu0 %v37_v8  ;;  %175 = vmatpush.msra.mxu1 %v37_v8 }
  0x14   :  { %179 = vmatpush.msra.mxu2 %v36_v9  ;;  %180 = vmatpush.msra.mxu3 %v36_v9 }
  0x15   :  { %59 = vmatpush.msra.mxu0 %v36_v9  ;;  %178 = vmatpush.msra.mxu1 %v36_v9 }
  0x16   :  { %182 = vmatpush.msra.mxu2 %v35_v10  ;;  %183 = vmatpush.msra.mxu3 %v35_v10 }
  0x17   :  { %60 = vmatpush.msra.mxu0 %v35_v10  ;;  %181 = vmatpush.msra.mxu1 %v35_v10 }
  0x18   :  { %185 = vmatpush.msra.mxu2 %v34_v11  ;;  %186 = vmatpush.msra.mxu3 %v34_v11 }
  0x19   :  { %61 = vmatpush.msra.mxu0 %v34_v11  ;;  %184 = vmatpush.msra.mxu1 %v34_v11 }
  0x1a   :  { %188 = vmatpush.msra.mxu2 %v33_v12  ;;  %189 = vmatpush.msra.mxu3 %v33_v12 }
  0x1b   :  { %62 = vmatpush.msra.mxu0 %v33_v12  ;;  %187 = vmatpush.msra.mxu1 %v33_v12 }
  0x1c   :  { %191 = vmatpush.msra.mxu2 %v32_v13  ;;  %192 = vmatpush.msra.mxu3 %v32_v13 }
  0x1d   :  { %63 = vmatpush.msra.mxu0 %v32_v13  ;;  %190 = vmatpush.msra.mxu1 %v32_v13 }
  0x1e   :  { %194 = vmatpush.msra.mxu2 %v31_v14  ;;  %195 = vmatpush.msra.mxu3 %v31_v14 }
  0x1f   :  { %64 = vmatpush.msra.mxu0 %v31_v14  ;;  %193 = vmatpush.msra.mxu1 %v31_v14 }
  0x20   :  { %197 = vmatpush.msra.mxu2 %v30_v15  ;;  %198 = vmatpush.msra.mxu3 %v30_v15 }
  0x21   :  { %90 = vmatmul.f32.vlgmr.msra.gmra.mxu2 %v22_v16  ;;  %102 = vmatmul.f32.vlgmr.msra.gmra.mxu3 %v26_v17 }
  0x22   :  { %65 = vmatpush.msra.mxu0 %v30_v15  ;;  %196 = vmatpush.msra.mxu1 %v30_v15 }
  0x23   :  { %66 = vmatmul.f32.vlgmr.msra.gmra.mxu0 %v14_v18  ;;  %78 = vmatmul.f32.vlgmr.msra.gmra.mxu1 %v18_v19 }
  0x29   :  { %93 = vmatmul.f32.gmra.mxu2 %v23_v20  ;;  %105 = vmatmul.f32.gmra.mxu3 %v27_v21 }
  0x2b   :  { %69 = vmatmul.f32.gmra.mxu0 %v15_v22  ;;  %81 = vmatmul.f32.gmra.mxu1 %v19_v23 }
  0x31   :  { %96 = vmatmul.f32.gmra.mxu2 %v24_v24  ;;  %108 = vmatmul.f32.gmra.mxu3 %v28_v25 }
  0x33   :  { %72 = vmatmul.f32.gmra.mxu0 %v16_v26  ;;  %84 = vmatmul.f32.gmra.mxu1 %v20_v27 }
  0x39   :  { %99 = vmatmul.f32.gmra.mxu2 %v25_v28  ;;  %111 = vmatmul.f32.gmra.mxu3 %v29_v29 }
  0x3b   :  { %75 = vmatmul.f32.gmra.mxu0 %v17_v30  ;;  %87 = vmatmul.f32.gmra.mxu1 %v21_v31 }
  0xa0   :  { %v67_v33 = vpop.f32.mrf.mxu0  ;;  %v79_v34 = vpop.f32.mrf.mxu1 }
  0xa1   :  { %v68_v35 = vadd.f32 %v199_v32, %v67_v33  ;;  %v80_v36 = vadd.f32 %v199_v32, %v79_v34 }
  0xa3   :  { %v115_v37 = vmax.f32 %v68_v35, 0.0  ;;  %v119_v38 = vmax.f32 %v80_v36, 0.0 }
  0xa4   :  { %v91_v39 = vpop.f32.mrf.mxu2  ;;  %v103_v40 = vpop.f32.mrf.mxu3 }
  0xa5   :  { %131 = vst [vmem:[%s370_s3] sm:$0xff] %v115_v37  ;;  %v92_v41 = vadd.f32 %v199_v32, %v91_v39  ;;  %v104_v42 = vadd.f32 %v199_v32, %v103_v40 }
  0xa6   :  { %135 = vst [vmem:[%s370_s3 + $0x20] sm:$0xff] %v119_v38 }
  0xa7   :  { %v123_v43 = vmax.f32 %v92_v41, 0.0  ;;  %v127_v44 = vmax.f32 %v104_v42, 0.0 }
  0xa8   :  { %v70_v45 = vpop.f32.mrf.mxu0  ;;  %v82_v46 = vpop.f32.mrf.mxu1 }
  0xa9   :  { %139 = vst [vmem:[%s370_s3 + $0x40] sm:$0xff] %v123_v43  ;;  %v71_v47 = vadd.f32 %v199_v32, %v70_v45  ;;  %v83_v48 = vadd.f32 %v199_v32, %v82_v46 }
  0xaa   :  { %143 = vst [vmem:[%s370_s3 + $0x60] sm:$0xff] %v127_v44 }
  0xab   :  { %v116_v49 = vmax.f32 %v71_v47, 0.0  ;;  %v120_v50 = vmax.f32 %v83_v48, 0.0 }
  0xac   :  { %v94_v51 = vpop.f32.mrf.mxu2  ;;  %v106_v52 = vpop.f32.mrf.mxu3 }
  0xad   :  { %132 = vst [vmem:[%s370_s3 + $0x8] sm:$0xff] %v116_v49  ;;  %v95_v53 = vadd.f32 %v199_v32, %v94_v51  ;;  %v107_v54 = vadd.f32 %v199_v32, %v106_v52 }
  0xae   :  { %136 = vst [vmem:[%s370_s3 + $0x28] sm:$0xff] %v120_v50 }
  0xaf   :  { %v124_v55 = vmax.f32 %v95_v53, 0.0  ;;  %v128_v56 = vmax.f32 %v107_v54, 0.0 }
  0xb0   :  { %v73_v57 = vpop.f32.mrf.mxu0  ;;  %v85_v58 = vpop.f32.mrf.mxu1 }
  0xb1   :  { %140 = vst [vmem:[%s370_s3 + $0x48] sm:$0xff] %v124_v55  ;;  %v74_v59 = vadd.f32 %v199_v32, %v73_v57  ;;  %v86_v60 = vadd.f32 %v199_v32, %v85_v58 }
  0xb2   :  { %144 = vst [vmem:[%s370_s3 + $0x68] sm:$0xff] %v128_v56 }
  0xb3   :  { %v117_v61 = vmax.f32 %v74_v59, 0.0  ;;  %v121_v62 = vmax.f32 %v86_v60, 0.0 }
  0xb4   :  { %v97_v63 = vpop.f32.mrf.mxu2  ;;  %v109_v0 = vpop.f32.mrf.mxu3 }
  0xb5   :  { %133 = vst [vmem:[%s370_s3 + $0x10] sm:$0xff] %v117_v61  ;;  %v98_v1 = vadd.f32 %v199_v32, %v97_v63  ;;  %v110_v2 = vadd.f32 %v199_v32, %v109_v0 }
  0xb6   :  { %137 = vst [vmem:[%s370_s3 + $0x30] sm:$0xff] %v121_v62 }
  0xb7   :  { %v125_v3 = vmax.f32 %v98_v1, 0.0  ;;  %v129_v4 = vmax.f32 %v110_v2, 0.0 }
  0xb8   :  { %v76_v5 = vpop.f32.mrf.mxu0  ;;  %v88_v6 = vpop.f32.mrf.mxu1 }
  0xb9   :  { %141 = vst [vmem:[%s370_s3 + $0x50] sm:$0xff] %v125_v3  ;;  %v77_v7 = vadd.f32 %v199_v32, %v76_v5  ;;  %v89_v8 = vadd.f32 %v199_v32, %v88_v6 }
  0xba   :  { %145 = vst [vmem:[%s370_s3 + $0x70] sm:$0xff] %v129_v4 }
  0xbb   :  { %v118_v9 = vmax.f32 %v77_v7, 0.0  ;;  %v122_v10 = vmax.f32 %v89_v8, 0.0 }
  0xbc   :  { %v100_v11 = vpop.f32.mrf.mxu2  ;;  %v112_v12 = vpop.f32.mrf.mxu3 }
  0xbd   :  { %134 = vst [vmem:[%s370_s3 + $0x18] sm:$0xff] %v118_v9  ;;  %v101_v13 = vadd.f32 %v199_v32, %v100_v11  ;;  %v113_v14 = vadd.f32 %v199_v32, %v112_v12 }
  0xbe   :  { %138 = vst [vmem:[%s370_s3 + $0x38] sm:$0xff] %v122_v10 }
  0xbf   :  { %v126_v15 = vmax.f32 %v101_v13, 0.0  ;;  %v130_v16 = vmax.f32 %v113_v14, 0.0 }
  0xc1   :  { %142 = vst [vmem:[%s370_s3 + $0x58] sm:$0xff] %v126_v15 }
  0xc2   :  { %146 = vst [vmem:[%s370_s3 + $0x78] sm:$0xff] %v130_v16 }

// kernel: autoencoder_forward.9
= control target key start
LH: loop header
LB: loop body
LE: loop exit
PB: predicated region body
PF: predicated region fallthrough
CT: control target
= control target key end

     0   :  { %s316_s1 = inlined_call_operand.vmem [shape: f32[256,128], index: 1, kind: input, shape index: {}]   ;;  %s317_s2 = inlined_call_operand.vmem [shape: f32[1,128], index: 2, kind: input, shape index: {}]   ;;  %s318_s0 = inlined_call_operand.vmem [shape: f32[32,256], index: 0, kind: input, shape index: {}]   ;;  %s319_s3 = inlined_call_operand.vmem [shape: f32[32,128], index: 3, kind: output, shape index: {}]  }
   0x1   :  { %v37_v0 = vld [vmem:[%s316_s1 + $0x78] sm:$0xff]  ;;  %v36_v1 = vld [vmem:[%s316_s1 + $0x70] sm:$0xff]  ;;  %v35_v4 = vld [vmem:[%s316_s1 + $0x68] sm:$0xff] }
   0x2   :  { %v53_v2 = vld [vmem:[%s316_s1 + $0xf8] sm:$0xff]  ;;  %128 = vmatpush.msra.mxu2 %v37_v0  ;;  %v52_v3 = vld [vmem:[%s316_s1 + $0xf0] sm:$0xff]  ;;  %58 = vmatpush.msra.mxu0 %v37_v0  ;;  %v51_v5 = vld [vmem:[%s316_s1 + $0xe8] sm:$0xff] }
   0x3   :  { %144 = vmatpush.msra.mxu3 %v53_v2  ;;  %87 = vmatpush.msra.mxu1 %v53_v2  ;;  %v34_v6 = vld [vmem:[%s316_s1 + $0x60] sm:$0xff]  ;;  %v33_v8 = vld [vmem:[%s316_s1 + $0x58] sm:$0xff]  ;;  %v32_v10 = vld [vmem:[%s316_s1 + $0x50] sm:$0xff] }
   0x4   :  { %129 = vmatpush.msra.mxu2 %v36_v1  ;;  %59 = vmatpush.msra.mxu0 %v36_v1  ;;  %v50_v7 = vld [vmem:[%s316_s1 + $0xe0] sm:$0xff]  ;;  %v49_v9 = vld [vmem:[%s316_s1 + $0xd8] sm:$0xff]  ;;  %v48_v11 = vld [vmem:[%s316_s1 + $0xd0] sm:$0xff] }
   0x5   :  { %145 = vmatpush.msra.mxu3 %v52_v3  ;;  %88 = vmatpush.msra.mxu1 %v52_v3  ;;  %v31_v12 = vld [vmem:[%s316_s1 + $0x48] sm:$0xff]  ;;  %v30_v14 = vld [vmem:[%s316_s1 + $0x40] sm:$0xff]  ;;  %v29_v16 = vld [vmem:[%s316_s1 + $0x38] sm:$0xff] }
   0x6   :  { %130 = vmatpush.msra.mxu2 %v35_v4  ;;  %60 = vmatpush.msra.mxu0 %v35_v4  ;;  %v47_v13 = vld [vmem:[%s316_s1 + $0xc8] sm:$0xff]  ;;  %v46_v15 = vld [vmem:[%s316_s1 + $0xc0] sm:$0xff]  ;;  %v45_v17 = vld [vmem:[%s316_s1 + $0xb8] sm:$0xff] }
   0x7   :  { %146 = vmatpush.msra.mxu3 %v51_v5  ;;  %89 = vmatpush.msra.mxu1 %v51_v5  ;;  %v28_v18 = vld [vmem:[%s316_s1 + $0x30] sm:$0xff]  ;;  %v27_v20 = vld [vmem:[%s316_s1 + $0x28] sm:$0xff]  ;;  %v26_v22 = vld [vmem:[%s316_s1 + $0x20] sm:$0xff] }
   0x8   :  { %131 = vmatpush.msra.mxu2 %v34_v6  ;;  %61 = vmatpush.msra.mxu0 %v34_v6  ;;  %v44_v19 = vld [vmem:[%s316_s1 + $0xb0] sm:$0xff]  ;;  %v43_v21 = vld [vmem:[%s316_s1 + $0xa8] sm:$0xff]  ;;  %v42_v23 = vld [vmem:[%s316_s1 + $0xa0] sm:$0xff] }
   0x9   :  { %147 = vmatpush.msra.mxu3 %v50_v7  ;;  %90 = vmatpush.msra.mxu1 %v50_v7  ;;  %v25_v24 = vld [vmem:[%s316_s1 + $0x18] sm:$0xff]  ;;  %v24_v26 = vld [vmem:[%s316_s1 + $0x10] sm:$0xff]  ;;  %v23_v28 = vld [vmem:[%s316_s1 + $0x8] sm:$0xff] }
   0xa   :  { %132 = vmatpush.msra.mxu2 %v33_v8  ;;  %62 = vmatpush.msra.mxu0 %v33_v8  ;;  %v41_v25 = vld [vmem:[%s316_s1 + $0x98] sm:$0xff]  ;;  %v40_v27 = vld [vmem:[%s316_s1 + $0x90] sm:$0xff]  ;;  %v39_v29 = vld [vmem:[%s316_s1 + $0x88] sm:$0xff] }
   0xb   :  { %148 = vmatpush.msra.mxu3 %v49_v9  ;;  %91 = vmatpush.msra.mxu1 %v49_v9  ;;  %v22_v30 = vld [vmem:[%s316_s1] sm:$0xff]  ;;  %v19_v33 = vld [vmem:[%s318_s0 + $0x28] sm:$0xff]  ;;  %v20_v36 = vld [vmem:[%s318_s0 + $0x30] sm:$0xff] }
   0xc   :  { %133 = vmatpush.msra.mxu2 %v32_v10  ;;  %63 = vmatpush.msra.mxu0 %v32_v10  ;;  %v38_v31 = vld [vmem:[%s316_s1 + $0x80] sm:$0xff]  ;;  %v15_v35 = vld [vmem:[%s318_s0 + $0x8] sm:$0xff]  ;;  %v21_v37 = vld [vmem:[%s318_s0 + $0x38] sm:$0xff] }
   0xd   :  { %149 = vmatpush.msra.mxu3 %v48_v11  ;;  %92 = vmatpush.msra.mxu1 %v48_v11  ;;  %v18_v32 = vld [vmem:[%s318_s0 + $0x20] sm:$0xff]  ;;  %v16_v38 = vld [vmem:[%s318_s0 + $0x10] sm:$0xff]  ;;  %v17_v39 = vld [vmem:[%s318_s0 + $0x18] sm:$0xff] }
   0xe   :  { %134 = vmatpush.msra.mxu2 %v31_v12  ;;  %64 = vmatpush.msra.mxu0 %v31_v12  ;;  %v14_v34 = vld [vmem:[%s318_s0] sm:$0xff] }
   0xf   :  { %150 = vmatpush.msra.mxu3 %v47_v13  ;;  %93 = vmatpush.msra.mxu1 %v47_v13  ;;  %v160_v40 = vld [vmem:[%s317_s2] ss:$0 sm:$0xff] }
  0x10   :  { %135 = vmatpush.msra.mxu2 %v30_v14  ;;  %65 = vmatpush.msra.mxu0 %v30_v14 }
  0x11   :  { %151 = vmatpush.msra.mxu3 %v46_v15  ;;  %94 = vmatpush.msra.mxu1 %v46_v15 }
  0x12   :  { %136 = vmatpush.msra.mxu2 %v29_v16  ;;  %66 = vmatpush.msra.mxu0 %v29_v16 }
  0x13   :  { %152 = vmatpush.msra.mxu3 %v45_v17  ;;  %95 = vmatpush.msra.mxu1 %v45_v17 }
  0x14   :  { %137 = vmatpush.msra.mxu2 %v28_v18  ;;  %67 = vmatpush.msra.mxu0 %v28_v18 }
  0x15   :  { %153 = vmatpush.msra.mxu3 %v44_v19  ;;  %96 = vmatpush.msra.mxu1 %v44_v19 }
  0x16   :  { %138 = vmatpush.msra.mxu2 %v27_v20  ;;  %68 = vmatpush.msra.mxu0 %v27_v20 }
  0x17   :  { %154 = vmatpush.msra.mxu3 %v43_v21  ;;  %97 = vmatpush.msra.mxu1 %v43_v21 }
  0x18   :  { %139 = vmatpush.msra.mxu2 %v26_v22  ;;  %69 = vmatpush.msra.mxu0 %v26_v22 }
  0x19   :  { %155 = vmatpush.msra.mxu3 %v42_v23  ;;  %98 = vmatpush.msra.mxu1 %v42_v23 }
  0x1a   :  { %140 = vmatpush.msra.mxu2 %v25_v24  ;;  %70 = vmatpush.msra.mxu0 %v25_v24 }
  0x1b   :  { %156 = vmatpush.msra.mxu3 %v41_v25  ;;  %99 = vmatpush.msra.mxu1 %v41_v25 }
  0x1c   :  { %141 = vmatpush.msra.mxu2 %v24_v26  ;;  %71 = vmatpush.msra.mxu0 %v24_v26 }
  0x1d   :  { %157 = vmatpush.msra.mxu3 %v40_v27  ;;  %100 = vmatpush.msra.mxu1 %v40_v27 }
  0x1e   :  { %142 = vmatpush.msra.mxu2 %v23_v28  ;;  %72 = vmatpush.msra.mxu0 %v23_v28 }
  0x1f   :  { %158 = vmatpush.msra.mxu3 %v39_v29  ;;  %101 = vmatpush.msra.mxu1 %v39_v29 }
  0x20   :  { %143 = vmatpush.msra.mxu2 %v22_v30  ;;  %73 = vmatpush.msra.mxu0 %v22_v30 }
  0x21   :  { %159 = vmatpush.msra.mxu3 %v38_v31  ;;  %80 = vmatmul.f32.vlgmr.msra.gmra.mxu2 %v18_v32 }
  0x22   :  { %109 = vmatmul.f32.vlgmr.msra.gmra.mxu3 %v19_v33  ;;  %102 = vmatpush.msra.mxu1 %v38_v31 }
  0x23   :  { %74 = vmatmul.f32.vlgmr.msra.gmra.mxu0 %v14_v34  ;;  %103 = vmatmul.f32.vlgmr.msra.gmra.mxu1 %v15_v35 }
  0x29   :  { %83 = vmatmul.f32.gmra.mxu2 %v20_v36 }
  0x2a   :  { %112 = vmatmul.f32.gmra.mxu3 %v21_v37 }
  0x2b   :  { %77 = vmatmul.f32.gmra.mxu0 %v16_v38  ;;  %106 = vmatmul.f32.gmra.mxu1 %v17_v39 }
  0xa0   :  { %v75_v41 = vpop.f32.mrf.mxu0  ;;  %v104_v42 = vpop.f32.mrf.mxu1 }
  0xa1   :  { %v76_v43 = vadd.f32 %v160_v40, %v75_v41 }
  0xa3   :  { %v105_v44 = vadd.f32 %v104_v42, %v76_v43 }
  0xa4   :  { %v81_v45 = vpop.f32.mrf.mxu2 }
  0xa5   :  { %v110_v46 = vpop.f32.mrf.mxu3  ;;  %v82_v47 = vadd.f32 %v160_v40, %v81_v45  ;;  %v116_v48 = vmax.f32 %v105_v44, 0.0 }
  0xa7   :  { %120 = vst [vmem:[%s319_s3] sm:$0xff] %v116_v48  ;;  %v111_v49 = vadd.f32 %v110_v46, %v82_v47 }
  0xa8   :  { %v78_v50 = vpop.f32.mrf.mxu0  ;;  %v107_v51 = vpop.f32.mrf.mxu1 }
  0xa9   :  { %v118_v52 = vmax.f32 %v111_v49, 0.0  ;;  %v79_v53 = vadd.f32 %v160_v40, %v78_v50 }
  0xab   :  { %122 = vst [vmem:[%s319_s3 + $0x10] sm:$0xff] %v118_v52  ;;  %v108_v54 = vadd.f32 %v107_v51, %v79_v53 }
  0xac   :  { %v84_v55 = vpop.f32.mrf.mxu2 }
  0xad   :  { %v113_v56 = vpop.f32.mrf.mxu3  ;;  %v85_v57 = vadd.f32 %v160_v40, %v84_v55  ;;  %v117_v58 = vmax.f32 %v108_v54, 0.0 }
  0xaf   :  { %121 = vst [vmem:[%s319_s3 + $0x8] sm:$0xff] %v117_v58  ;;  %v114_v59 = vadd.f32 %v113_v56, %v85_v57 }
  0xb1   :  { %v119_v60 = vmax.f32 %v114_v59, 0.0 }
  0xb3   :  { %123 = vst [vmem:[%s319_s3 + $0x18] sm:$0xff] %v119_v60 }

// kernel: autoencoder_forward.10
= control target key start
LH: loop header
LB: loop body
LE: loop exit
PB: predicated region body
PF: predicated region fallthrough
CT: control target
= control target key end

     0   :  { %s315_s1 = inlined_call_operand.vmem [shape: f32[384,128], index: 1, kind: input, shape index: {}]   ;;  %s316_s2 = inlined_call_operand.vmem [shape: f32[1,128], index: 2, kind: input, shape index: {}]   ;;  %s317_s0 = inlined_call_operand.vmem [shape: f32[8,384], index: 0, kind: input, shape index: {}]   ;;  %s318_s3 = inlined_call_operand.vmem [shape: f32[8,128], index: 3, kind: output, shape index: {}]  }
   0x1   :  { %v64_v0 = vld [vmem:[%s315_s1 + $0x178] sm:$0xff]  ;;  %v63_v2 = vld [vmem:[%s315_s1 + $0x170] sm:$0xff]  ;;  %v62_v5 = vld [vmem:[%s315_s1 + $0x168] sm:$0xff] }
   0x2   :  { %v32_v1 = vld [vmem:[%s315_s1 + $0x78] sm:$0xff]  ;;  %109 = vmatpush.msra.mxu2 %v64_v0  ;;  %v31_v3 = vld [vmem:[%s315_s1 + $0x70] sm:$0xff]  ;;  %v30_v6 = vld [vmem:[%s315_s1 + $0x68] sm:$0xff] }
   0x3   :  { %69 = vmatpush.msra.mxu0 %v32_v1  ;;  %v48_v4 = vld [vmem:[%s315_s1 + $0xf8] sm:$0xff]  ;;  %v47_v7 = vld [vmem:[%s315_s1 + $0xf0] sm:$0xff]  ;;  %v46_v8 = vld [vmem:[%s315_s1 + $0xe8] sm:$0xff] }
   0x4   :  { %89 = vmatpush.msra.mxu1 %v48_v4  ;;  %110 = vmatpush.msra.mxu2 %v63_v2  ;;  %v61_v9 = vld [vmem:[%s315_s1 + $0x160] sm:$0xff]  ;;  %v60_v12 = vld [vmem:[%s315_s1 + $0x158] sm:$0xff]  ;;  %v59_v15 = vld [vmem:[%s315_s1 + $0x150] sm:$0xff] }
   0x5   :  { %70 = vmatpush.msra.mxu0 %v31_v3  ;;  %v29_v10 = vld [vmem:[%s315_s1 + $0x60] sm:$0xff]  ;;  %v28_v13 = vld [vmem:[%s315_s1 + $0x58] sm:$0xff]  ;;  %v27_v16 = vld [vmem:[%s315_s1 + $0x50] sm:$0xff] }
   0x6   :  { %90 = vmatpush.msra.mxu1 %v47_v7  ;;  %111 = vmatpush.msra.mxu2 %v62_v5  ;;  %v45_v11 = vld [vmem:[%s315_s1 + $0xe0] sm:$0xff]  ;;  %v44_v14 = vld [vmem:[%s315_s1 + $0xd8] sm:$0xff]  ;;  %v43_v17 = vld [vmem:[%s315_s1 + $0xd0] sm:$0xff] }
   0x7   :  { %71 = vmatpush.msra.mxu0 %v30_v6  ;;  %v58_v18 = vld [vmem:[%s315_s1 + $0x148] sm:$0xff]  ;;  %v57_v21 = vld [vmem:[%s315_s1 + $0x140] sm:$0xff]  ;;  %v56_v24 = vld [vmem:[%s315_s1 + $0x138] sm:$0xff] }
   0x8   :  { %91 = vmatpush.msra.mxu1 %v46_v8  ;;  %112 = vmatpush.msra.mxu2 %v61_v9  ;;  %v26_v19 = vld [vmem:[%s315_s1 + $0x48] sm:$0xff]  ;;  %v25_v22 = vld [vmem:[%s315_s1 + $0x40] sm:$0xff]  ;;  %v24_v25 = vld [vmem:[%s315_s1 + $0x38] sm:$0xff] }
   0x9   :  { %72 = vmatpush.msra.mxu0 %v29_v10  ;;  %v42_v20 = vld [vmem:[%s315_s1 + $0xc8] sm:$0xff]  ;;  %v41_v23 = vld [vmem:[%s315_s1 + $0xc0] sm:$0xff]  ;;  %v40_v26 = vld [vmem:[%s315_s1 + $0xb8] sm:$0xff] }
   0xa   :  { %92 = vmatpush.msra.mxu1 %v45_v11  ;;  %113 = vmatpush.msra.mxu2 %v60_v12  ;;  %v55_v27 = vld [vmem:[%s315_s1 + $0x130] sm:$0xff]  ;;  %v54_v30 = vld [vmem:[%s315_s1 + $0x128] sm:$0xff]  ;;  %v53_v33 = vld [vmem:[%s315_s1 + $0x120] sm:$0xff] }
   0xb   :  { %73 = vmatpush.msra.mxu0 %v28_v13  ;;  %v23_v28 = vld [vmem:[%s315_s1 + $0x30] sm:$0xff]  ;;  %v22_v31 = vld [vmem:[%s315_s1 + $0x28] sm:$0xff]  ;;  %v21_v34 = vld [vmem:[%s315_s1 + $0x20] sm:$0xff] }
   0xc   :  { %93 = vmatpush.msra.mxu1 %v44_v14  ;;  %114 = vmatpush.msra.mxu2 %v59_v15  ;;  %v39_v29 = vld [vmem:[%s315_s1 + $0xb0] sm:$0xff]  ;;  %v38_v32 = vld [vmem:[%s315_s1 + $0xa8] sm:$0xff]  ;;  %v37_v35 = vld [vmem:[%s315_s1 + $0xa0] sm:$0xff] }
   0xd   :  { %74 = vmatpush.msra.mxu0 %v27_v16  ;;  %v52_v36 = vld [vmem:[%s315_s1 + $0x118] sm:$0xff]  ;;  %v51_v39 = vld [vmem:[%s315_s1 + $0x110] sm:$0xff]  ;;  %v50_v42 = vld [vmem:[%s315_s1 + $0x108] sm:$0xff] }
   0xe   :  { %94 = vmatpush.msra.mxu1 %v43_v17  ;;  %115 = vmatpush.msra.mxu2 %v58_v18  ;;  %v20_v37 = vld [vmem:[%s315_s1 + $0x18] sm:$0xff]  ;;  %v19_v40 = vld [vmem:[%s315_s1 + $0x10] sm:$0xff]  ;;  %v18_v43 = vld [vmem:[%s315_s1 + $0x8] sm:$0xff] }
   0xf   :  { %75 = vmatpush.msra.mxu0 %v26_v19  ;;  %v36_v38 = vld [vmem:[%s315_s1 + $0x98] sm:$0xff]  ;;  %v35_v41 = vld [vmem:[%s315_s1 + $0x90] sm:$0xff]  ;;  %v34_v44 = vld [vmem:[%s315_s1 + $0x88] sm:$0xff] }
  0x10   :  { %95 = vmatpush.msra.mxu1 %v42_v20  ;;  %116 = vmatpush.msra.mxu2 %v57_v21  ;;  %v49_v45 = vld [vmem:[%s315_s1 + $0x100] sm:$0xff]  ;;  %v16_v47 = vld [vmem:[%s317_s0 + $0x10] sm:$0xff]  ;;  %v15_v50 = vld [vmem:[%s317_s0 + $0x8] sm:$0xff] }
  0x11   :  { %76 = vmatpush.msra.mxu0 %v25_v22  ;;  %v17_v46 = vld [vmem:[%s315_s1] sm:$0xff] }
  0x12   :  { %96 = vmatpush.msra.mxu1 %v41_v23  ;;  %117 = vmatpush.msra.mxu2 %v56_v24  ;;  %v14_v48 = vld [vmem:[%s317_s0] sm:$0xff] }
  0x13   :  { %77 = vmatpush.msra.mxu0 %v24_v25  ;;  %v33_v49 = vld [vmem:[%s315_s1 + $0x80] sm:$0xff] }
  0x14   :  { %97 = vmatpush.msra.mxu1 %v40_v26  ;;  %118 = vmatpush.msra.mxu2 %v55_v27  ;;  %v135_v51 = vld [vmem:[%s316_s2] ss:$0 sm:$0xff] }
  0x15   :  { %78 = vmatpush.msra.mxu0 %v23_v28 }
  0x16   :  { %98 = vmatpush.msra.mxu1 %v39_v29  ;;  %119 = vmatpush.msra.mxu2 %v54_v30 }
  0x17   :  { %79 = vmatpush.msra.mxu0 %v22_v31 }
  0x18   :  { %99 = vmatpush.msra.mxu1 %v38_v32  ;;  %120 = vmatpush.msra.mxu2 %v53_v33 }
  0x19   :  { %80 = vmatpush.msra.mxu0 %v21_v34 }
  0x1a   :  { %100 = vmatpush.msra.mxu1 %v37_v35  ;;  %121 = vmatpush.msra.mxu2 %v52_v36 }
  0x1b   :  { %81 = vmatpush.msra.mxu0 %v20_v37 }
  0x1c   :  { %101 = vmatpush.msra.mxu1 %v36_v38  ;;  %122 = vmatpush.msra.mxu2 %v51_v39 }
  0x1d   :  { %82 = vmatpush.msra.mxu0 %v19_v40 }
  0x1e   :  { %102 = vmatpush.msra.mxu1 %v35_v41  ;;  %123 = vmatpush.msra.mxu2 %v50_v42 }
  0x1f   :  { %83 = vmatpush.msra.mxu0 %v18_v43 }
  0x20   :  { %103 = vmatpush.msra.mxu1 %v34_v44  ;;  %124 = vmatpush.msra.mxu2 %v49_v45 }
  0x21   :  { %84 = vmatpush.msra.mxu0 %v17_v46  ;;  %125 = vmatmul.f32.vlgmr.msra.gmra.mxu2 %v16_v47 }
  0x22   :  { %85 = vmatmul.f32.vlgmr.msra.gmra.mxu0 %v14_v48  ;;  %104 = vmatpush.msra.mxu1 %v33_v49 }
  0x23   :  { %105 = vmatmul.f32.vlgmr.msra.gmra.mxu1 %v15_v50 }
  0x9f   :  { %v86_v52 = vpop.f32.mrf.mxu0 }
  0xa0   :  { %v87_v53 = vadd.f32 %v135_v51, %v86_v52  ;;  %v106_v54 = vpop.f32.mrf.mxu1 }
  0xa2   :  { %v107_v55 = vadd.f32 %v106_v54, %v87_v53 }
  0xa4   :  { %v126_v56 = vpop.f32.mrf.mxu2 }
  0xa5   :  { %v127_v57 = vadd.f32 %v126_v56, %v107_v55 }
  0xa7   :  { %v129_v58 = vmax.f32 %v127_v57, 0.0 }
  0xa9   :  { %130 = vst [vmem:[%s318_s3] sm:$0xff] %v129_v58 }

// kernel: autoencoder_forward.11
= control target key start
LH: loop header
LB: loop body
LE: loop exit
PB: predicated region body
PF: predicated region fallthrough
CT: control target
= control target key end

     0   :  { %s491_s1 = inlined_call_operand.vmem [shape: f32[640,128], index: 1, kind: input, shape index: {}]   ;;  %s492_s2 = inlined_call_operand.vmem [shape: f32[1,128], index: 2, kind: input, shape index: {}]   ;;  %s493_s0 = inlined_call_operand.vmem [shape: f32[8,640], index: 0, kind: input, shape index: {}]   ;;  %s494_s3 = inlined_call_operand.vmem [shape: f32[8,128], index: 3, kind: output, shape index: {}]  }
   0x1   :  { %v34_v0 = vld [vmem:[%s491_s1 + $0x78] sm:$0xff]  ;;  %v33_v1 = vld [vmem:[%s491_s1 + $0x70] sm:$0xff]  ;;  %v32_v2 = vld [vmem:[%s491_s1 + $0x68] sm:$0xff] }
   0x2   :  { %103 = vmatpush.msra.mxu0 %v34_v0  ;;  %v66_v3 = vld [vmem:[%s491_s1 + $0x178] sm:$0xff]  ;;  %v31_v4 = vld [vmem:[%s491_s1 + $0x60] sm:$0xff]  ;;  %v65_v5 = vld [vmem:[%s491_s1 + $0x170] sm:$0xff] }
   0x3   :  { %143 = vmatpush.msra.mxu2 %v66_v3  ;;  %v82_v6 = vld [vmem:[%s491_s1 + $0x1f8] sm:$0xff]  ;;  %v64_v8 = vld [vmem:[%s491_s1 + $0x168] sm:$0xff]  ;;  %v81_v10 = vld [vmem:[%s491_s1 + $0x1f0] sm:$0xff] }
   0x4   :  { %104 = vmatpush.msra.mxu0 %v33_v1  ;;  %163 = vmatpush.msra.mxu3 %v82_v6  ;;  %v50_v7 = vld [vmem:[%s491_s1 + $0xf8] sm:$0xff]  ;;  %v49_v11 = vld [vmem:[%s491_s1 + $0xf0] sm:$0xff]  ;;  %v63_v12 = vld [vmem:[%s491_s1 + $0x160] sm:$0xff] }
   0x5   :  { %v30_v9 = vld [vmem:[%s491_s1 + $0x58] sm:$0xff]  ;;  %144 = vmatpush.msra.mxu2 %v65_v5  ;;  %123 = vmatpush.msra.mxu1 %v50_v7  ;;  %v80_v13 = vld [vmem:[%s491_s1 + $0x1e8] sm:$0xff]  ;;  %v29_v14 = vld [vmem:[%s491_s1 + $0x50] sm:$0xff] }
   0x6   :  { %105 = vmatpush.msra.mxu0 %v32_v2  ;;  %164 = vmatpush.msra.mxu3 %v81_v10  ;;  %v48_v15 = vld [vmem:[%s491_s1 + $0xe8] sm:$0xff]  ;;  %v79_v16 = vld [vmem:[%s491_s1 + $0x1e0] sm:$0xff]  ;;  %v62_v17 = vld [vmem:[%s491_s1 + $0x158] sm:$0xff] }
   0x7   :  { %145 = vmatpush.msra.mxu2 %v64_v8  ;;  %124 = vmatpush.msra.mxu1 %v49_v11  ;;  %v47_v18 = vld [vmem:[%s491_s1 + $0xe0] sm:$0xff]  ;;  %v28_v19 = vld [vmem:[%s491_s1 + $0x48] sm:$0xff]  ;;  %v78_v20 = vld [vmem:[%s491_s1 + $0x1d8] sm:$0xff] }
   0x8   :  { %106 = vmatpush.msra.mxu0 %v31_v4  ;;  %165 = vmatpush.msra.mxu3 %v80_v13  ;;  %v61_v21 = vld [vmem:[%s491_s1 + $0x150] sm:$0xff]  ;;  %v46_v22 = vld [vmem:[%s491_s1 + $0xd8] sm:$0xff]  ;;  %v27_v23 = vld [vmem:[%s491_s1 + $0x40] sm:$0xff] }
   0x9   :  { %146 = vmatpush.msra.mxu2 %v63_v12  ;;  %125 = vmatpush.msra.mxu1 %v48_v15  ;;  %v77_v24 = vld [vmem:[%s491_s1 + $0x1d0] sm:$0xff]  ;;  %v60_v25 = vld [vmem:[%s491_s1 + $0x148] sm:$0xff]  ;;  %v26_v27 = vld [vmem:[%s491_s1 + $0x38] sm:$0xff] }
   0xa   :  { %107 = vmatpush.msra.mxu0 %v30_v9  ;;  %166 = vmatpush.msra.mxu3 %v79_v16  ;;  %v45_v26 = vld [vmem:[%s491_s1 + $0xd0] sm:$0xff]  ;;  %v76_v28 = vld [vmem:[%s491_s1 + $0x1c8] sm:$0xff]  ;;  %v59_v29 = vld [vmem:[%s491_s1 + $0x140] sm:$0xff] }
   0xb   :  { %147 = vmatpush.msra.mxu2 %v62_v17  ;;  %126 = vmatpush.msra.mxu1 %v47_v18  ;;  %v44_v30 = vld [vmem:[%s491_s1 + $0xc8] sm:$0xff]  ;;  %v25_v31 = vld [vmem:[%s491_s1 + $0x30] sm:$0xff]  ;;  %v75_v32 = vld [vmem:[%s491_s1 + $0x1c0] sm:$0xff] }
   0xc   :  { %108 = vmatpush.msra.mxu0 %v29_v14  ;;  %167 = vmatpush.msra.mxu3 %v78_v20  ;;  %v58_v33 = vld [vmem:[%s491_s1 + $0x138] sm:$0xff]  ;;  %v43_v34 = vld [vmem:[%s491_s1 + $0xc0] sm:$0xff]  ;;  %v24_v35 = vld [vmem:[%s491_s1 + $0x28] sm:$0xff] }
   0xd   :  { %148 = vmatpush.msra.mxu2 %v61_v21  ;;  %127 = vmatpush.msra.mxu1 %v46_v22  ;;  %v74_v36 = vld [vmem:[%s491_s1 + $0x1b8] sm:$0xff]  ;;  %v57_v37 = vld [vmem:[%s491_s1 + $0x130] sm:$0xff]  ;;  %v23_v39 = vld [vmem:[%s491_s1 + $0x20] sm:$0xff] }
   0xe   :  { %109 = vmatpush.msra.mxu0 %v28_v19  ;;  %168 = vmatpush.msra.mxu3 %v77_v24  ;;  %v42_v38 = vld [vmem:[%s491_s1 + $0xb8] sm:$0xff]  ;;  %v73_v40 = vld [vmem:[%s491_s1 + $0x1b0] sm:$0xff]  ;;  %v56_v41 = vld [vmem:[%s491_s1 + $0x128] sm:$0xff] }
   0xf   :  { %149 = vmatpush.msra.mxu2 %v60_v25  ;;  %128 = vmatpush.msra.mxu1 %v45_v26  ;;  %v41_v42 = vld [vmem:[%s491_s1 + $0xb0] sm:$0xff]  ;;  %v22_v43 = vld [vmem:[%s491_s1 + $0x18] sm:$0xff]  ;;  %v72_v44 = vld [vmem:[%s491_s1 + $0x1a8] sm:$0xff] }
  0x10   :  { %110 = vmatpush.msra.mxu0 %v27_v23  ;;  %169 = vmatpush.msra.mxu3 %v76_v28  ;;  %v55_v45 = vld [vmem:[%s491_s1 + $0x120] sm:$0xff]  ;;  %v40_v46 = vld [vmem:[%s491_s1 + $0xa8] sm:$0xff]  ;;  %v21_v47 = vld [vmem:[%s491_s1 + $0x10] sm:$0xff] }
  0x11   :  { %150 = vmatpush.msra.mxu2 %v59_v29  ;;  %129 = vmatpush.msra.mxu1 %v44_v30  ;;  %v71_v48 = vld [vmem:[%s491_s1 + $0x1a0] sm:$0xff]  ;;  %v54_v49 = vld [vmem:[%s491_s1 + $0x118] sm:$0xff]  ;;  %v20_v51 = vld [vmem:[%s491_s1 + $0x8] sm:$0xff] }
  0x12   :  { %111 = vmatpush.msra.mxu0 %v26_v27  ;;  %170 = vmatpush.msra.mxu3 %v75_v32  ;;  %v39_v50 = vld [vmem:[%s491_s1 + $0xa0] sm:$0xff]  ;;  %v70_v52 = vld [vmem:[%s491_s1 + $0x198] sm:$0xff]  ;;  %v53_v53 = vld [vmem:[%s491_s1 + $0x110] sm:$0xff] }
  0x13   :  { %151 = vmatpush.msra.mxu2 %v58_v33  ;;  %130 = vmatpush.msra.mxu1 %v43_v34  ;;  %v38_v54 = vld [vmem:[%s491_s1 + $0x98] sm:$0xff]  ;;  %v19_v55 = vld [vmem:[%s491_s1] sm:$0xff]  ;;  %v69_v56 = vld [vmem:[%s491_s1 + $0x190] sm:$0xff] }
  0x14   :  { %112 = vmatpush.msra.mxu0 %v25_v31  ;;  %171 = vmatpush.msra.mxu3 %v74_v36  ;;  %v98_v57 = vld [vmem:[%s491_s1 + $0x278] sm:$0xff]  ;;  %v52_v58 = vld [vmem:[%s491_s1 + $0x108] sm:$0xff]  ;;  %v37_v59 = vld [vmem:[%s491_s1 + $0x90] sm:$0xff] }
  0x15   :  { %152 = vmatpush.msra.mxu2 %v57_v37  ;;  %131 = vmatpush.msra.mxu1 %v42_v38  ;;  %v68_v60 = vld [vmem:[%s491_s1 + $0x188] sm:$0xff]  ;;  %v97_v61 = vld [vmem:[%s491_s1 + $0x270] sm:$0xff]  ;;  %v51_v62 = vld [vmem:[%s491_s1 + $0x100] sm:$0xff] }
  0x16   :  { %113 = vmatpush.msra.mxu0 %v24_v35  ;;  %172 = vmatpush.msra.mxu3 %v73_v40  ;;  %v16_v63 = vld [vmem:[%s493_s0 + $0x10] sm:$0xff]  ;;  %v36_v0 = vld [vmem:[%s491_s1 + $0x88] sm:$0xff]  ;;  %v67_v2 = vld [vmem:[%s491_s1 + $0x180] sm:$0xff] }
  0x17   :  { %153 = vmatpush.msra.mxu2 %v56_v41  ;;  %132 = vmatpush.msra.mxu1 %v41_v42  ;;  %v96_v1 = vld [vmem:[%s491_s1 + $0x268] sm:$0xff]  ;;  %v14_v3 = vld [vmem:[%s493_s0] sm:$0xff]  ;;  %v17_v4 = vld [vmem:[%s493_s0 + $0x18] sm:$0xff] }
  0x18   :  { %114 = vmatpush.msra.mxu0 %v23_v39  ;;  %173 = vmatpush.msra.mxu3 %v72_v44  ;;  %v95_v5 = vld [vmem:[%s491_s1 + $0x260] sm:$0xff]  ;;  %v15_v7 = vld [vmem:[%s493_s0 + $0x8] sm:$0xff]  ;;  %v94_v8 = vld [vmem:[%s491_s1 + $0x258] sm:$0xff] }
  0x19   :  { %154 = vmatpush.msra.mxu2 %v55_v45  ;;  %133 = vmatpush.msra.mxu1 %v40_v46  ;;  %v35_v6 = vld [vmem:[%s491_s1 + $0x80] sm:$0xff]  ;;  %v93_v9 = vld [vmem:[%s491_s1 + $0x250] sm:$0xff]  ;;  %v92_v10 = vld [vmem:[%s491_s1 + $0x248] sm:$0xff] }
  0x1a   :  { %115 = vmatpush.msra.mxu0 %v22_v43  ;;  %174 = vmatpush.msra.mxu3 %v71_v48  ;;  %v91_v11 = vld [vmem:[%s491_s1 + $0x240] sm:$0xff]  ;;  %v90_v12 = vld [vmem:[%s491_s1 + $0x238] sm:$0xff]  ;;  %v89_v13 = vld [vmem:[%s491_s1 + $0x230] sm:$0xff] }
  0x1b   :  { %155 = vmatpush.msra.mxu2 %v54_v49  ;;  %134 = vmatpush.msra.mxu1 %v39_v50  ;;  %v88_v14 = vld [vmem:[%s491_s1 + $0x228] sm:$0xff]  ;;  %v87_v15 = vld [vmem:[%s491_s1 + $0x220] sm:$0xff]  ;;  %v86_v16 = vld [vmem:[%s491_s1 + $0x218] sm:$0xff] }
  0x1c   :  { %116 = vmatpush.msra.mxu0 %v21_v47  ;;  %175 = vmatpush.msra.mxu3 %v70_v52  ;;  %v85_v17 = vld [vmem:[%s491_s1 + $0x210] sm:$0xff]  ;;  %v84_v18 = vld [vmem:[%s491_s1 + $0x208] sm:$0xff]  ;;  %v83_v19 = vld [vmem:[%s491_s1 + $0x200] sm:$0xff] }
  0x1d   :  { %156 = vmatpush.msra.mxu2 %v53_v53  ;;  %135 = vmatpush.msra.mxu1 %v38_v54  ;;  %v18_v20 = vld [vmem:[%s493_s0 + $0x20] sm:$0xff] }
  0x1e   :  { %117 = vmatpush.msra.mxu0 %v20_v51  ;;  %176 = vmatpush.msra.mxu3 %v69_v56  ;;  %v209_v21 = vld [vmem:[%s492_s2] ss:$0 sm:$0xff] }
  0x1f   :  { %157 = vmatpush.msra.mxu2 %v52_v58  ;;  %136 = vmatpush.msra.mxu1 %v37_v59 }
  0x20   :  { %118 = vmatpush.msra.mxu0 %v19_v55  ;;  %177 = vmatpush.msra.mxu3 %v68_v60 }
  0x21   :  { %158 = vmatpush.msra.mxu2 %v51_v62  ;;  %137 = vmatpush.msra.mxu1 %v36_v0 }
  0x22   :  { %183 = vmatpush.msrb.mxu0 %v98_v57  ;;  %159 = vmatmul.f32.vlgmr.msra.gmra.mxu2 %v16_v63 }
  0x23   :  { %178 = vmatpush.msra.mxu3 %v67_v2  ;;  %119 = vmatmul.f32.vlgmr.msra.gmra.mxu0 %v14_v3 }
  0x24   :  { %184 = vmatpush.msrb.mxu0 %v97_v61  ;;  %179 = vmatmul.f32.vlgmr.msra.gmra.mxu3 %v17_v4 }
  0x25   :  { %138 = vmatpush.msra.mxu1 %v35_v6 }
  0x26   :  { %185 = vmatpush.msrb.mxu0 %v96_v1  ;;  %139 = vmatmul.f32.vlgmr.msra.gmra.mxu1 %v15_v7 }
  0x28   :  { %186 = vmatpush.msrb.mxu0 %v95_v5 }
  0x2a   :  { %187 = vmatpush.msrb.mxu0 %v94_v8 }
  0x2c   :  { %188 = vmatpush.msrb.mxu0 %v93_v9 }
  0x2e   :  { %189 = vmatpush.msrb.mxu0 %v92_v10 }
  0x30   :  { %190 = vmatpush.msrb.mxu0 %v91_v11 }
  0x32   :  { %191 = vmatpush.msrb.mxu0 %v90_v12 }
  0x34   :  { %192 = vmatpush.msrb.mxu0 %v89_v13 }
  0x36   :  { %193 = vmatpush.msrb.mxu0 %v88_v14 }
  0x38   :  { %194 = vmatpush.msrb.mxu0 %v87_v15 }
  0x3a   :  { %195 = vmatpush.msrb.mxu0 %v86_v16 }
  0x3c   :  { %196 = vmatpush.msrb.mxu0 %v85_v17 }
  0x3e   :  { %197 = vmatpush.msrb.mxu0 %v84_v18 }
  0x40   :  { %198 = vmatpush.msrb.mxu0 %v83_v19 }
  0x41   :  { %199 = vmatmul.f32.vlgmr.msrb.gmra.mxu0 %v18_v20 }
  0xa0   :  { %v120_v22 = vpop.f32.mrf.mxu0 }
  0xa1   :  { %v121_v23 = vadd.f32 %v209_v21, %v120_v22 }
  0xa3   :  { %v140_v24 = vpop.f32.mrf.mxu1 }
  0xa4   :  { %v141_v25 = vadd.f32 %v140_v24, %v121_v23 }
  0xa5   :  { %v160_v26 = vpop.f32.mrf.mxu2 }
  0xa6   :  { %v161_v27 = vadd.f32 %v160_v26, %v141_v25 }
  0xa7   :  { %v180_v28 = vpop.f32.mrf.mxu3 }
  0xa8   :  { %v181_v29 = vadd.f32 %v180_v28, %v161_v27 }
  0xbe   :  { %v200_v30 = vpop.f32.mrf.mxu0 }
  0xbf   :  { %v201_v31 = vadd.f32 %v200_v30, %v181_v29 }
  0xc1   :  { %v203_v32 = vmax.f32 %v201_v31, 0.0 }
  0xc3   :  { %204 = vst [vmem:[%s494_s3] sm:$0xff] %v203_v32 }

// kernel: autoencoder_forward.13
= control target key start
LH: loop header
LB: loop body
LE: loop exit
PB: predicated region body
PF: predicated region fallthrough
CT: control target
= control target key end

     0   :  { %s227_s1 = inlined_call_operand.vmem [shape: f32[256,128], index: 1, kind: input, shape index: {}]   ;;  %s228_s2 = inlined_call_operand.vmem [shape: f32[1,128], index: 2, kind: input, shape index: {}]   ;;  %s229_s0 = inlined_call_operand.vmem [shape: f32[8,256], index: 0, kind: input, shape index: {}]   ;;  %s230_s3 = inlined_call_operand.vmem [shape: f32[8,128], index: 3, kind: output, shape index: {}]  }
   0x1   :  { %v31_v0 = vld [vmem:[%s227_s1 + $0x78] sm:$0xff]  ;;  %v30_v1 = vld [vmem:[%s227_s1 + $0x70] sm:$0xff]  ;;  %v29_v4 = vld [vmem:[%s227_s1 + $0x68] sm:$0xff] }
   0x2   :  { %v47_v2 = vld [vmem:[%s227_s1 + $0xf8] sm:$0xff]  ;;  %52 = vmatpush.msra.mxu0 %v31_v0  ;;  %v46_v3 = vld [vmem:[%s227_s1 + $0xf0] sm:$0xff]  ;;  %v45_v5 = vld [vmem:[%s227_s1 + $0xe8] sm:$0xff] }
   0x3   :  { %72 = vmatpush.msra.mxu1 %v47_v2  ;;  %v28_v6 = vld [vmem:[%s227_s1 + $0x60] sm:$0xff]  ;;  %v27_v8 = vld [vmem:[%s227_s1 + $0x58] sm:$0xff]  ;;  %v26_v10 = vld [vmem:[%s227_s1 + $0x50] sm:$0xff] }
   0x4   :  { %53 = vmatpush.msra.mxu0 %v30_v1  ;;  %v44_v7 = vld [vmem:[%s227_s1 + $0xe0] sm:$0xff]  ;;  %v43_v9 = vld [vmem:[%s227_s1 + $0xd8] sm:$0xff]  ;;  %v42_v11 = vld [vmem:[%s227_s1 + $0xd0] sm:$0xff] }
   0x5   :  { %73 = vmatpush.msra.mxu1 %v46_v3  ;;  %v25_v12 = vld [vmem:[%s227_s1 + $0x48] sm:$0xff]  ;;  %v24_v14 = vld [vmem:[%s227_s1 + $0x40] sm:$0xff]  ;;  %v23_v16 = vld [vmem:[%s227_s1 + $0x38] sm:$0xff] }
   0x6   :  { %54 = vmatpush.msra.mxu0 %v29_v4  ;;  %v41_v13 = vld [vmem:[%s227_s1 + $0xc8] sm:$0xff]  ;;  %v40_v15 = vld [vmem:[%s227_s1 + $0xc0] sm:$0xff]  ;;  %v39_v17 = vld [vmem:[%s227_s1 + $0xb8] sm:$0xff] }
   0x7   :  { %74 = vmatpush.msra.mxu1 %v45_v5  ;;  %v22_v18 = vld [vmem:[%s227_s1 + $0x30] sm:$0xff]  ;;  %v21_v20 = vld [vmem:[%s227_s1 + $0x28] sm:$0xff]  ;;  %v20_v22 = vld [vmem:[%s227_s1 + $0x20] sm:$0xff] }
   0x8   :  { %55 = vmatpush.msra.mxu0 %v28_v6  ;;  %v38_v19 = vld [vmem:[%s227_s1 + $0xb0] sm:$0xff]  ;;  %v37_v21 = vld [vmem:[%s227_s1 + $0xa8] sm:$0xff]  ;;  %v36_v23 = vld [vmem:[%s227_s1 + $0xa0] sm:$0xff] }
   0x9   :  { %75 = vmatpush.msra.mxu1 %v44_v7  ;;  %v19_v24 = vld [vmem:[%s227_s1 + $0x18] sm:$0xff]  ;;  %v18_v26 = vld [vmem:[%s227_s1 + $0x10] sm:$0xff]  ;;  %v17_v28 = vld [vmem:[%s227_s1 + $0x8] sm:$0xff] }
   0xa   :  { %56 = vmatpush.msra.mxu0 %v27_v8  ;;  %v35_v25 = vld [vmem:[%s227_s1 + $0x98] sm:$0xff]  ;;  %v34_v27 = vld [vmem:[%s227_s1 + $0x90] sm:$0xff]  ;;  %v33_v29 = vld [vmem:[%s227_s1 + $0x88] sm:$0xff] }
   0xb   :  { %76 = vmatpush.msra.mxu1 %v43_v9  ;;  %v16_v30 = vld [vmem:[%s227_s1] sm:$0xff]  ;;  %v15_v33 = vld [vmem:[%s229_s0 + $0x8] sm:$0xff] }
   0xc   :  { %57 = vmatpush.msra.mxu0 %v26_v10  ;;  %v32_v31 = vld [vmem:[%s227_s1 + $0x80] sm:$0xff] }
   0xd   :  { %77 = vmatpush.msra.mxu1 %v42_v11  ;;  %v14_v32 = vld [vmem:[%s229_s0] sm:$0xff] }
   0xe   :  { %58 = vmatpush.msra.mxu0 %v25_v12  ;;  %v98_v34 = vld [vmem:[%s228_s2] ss:$0 sm:$0xff] }
   0xf   :  { %78 = vmatpush.msra.mxu1 %v41_v13 }
  0x10   :  { %59 = vmatpush.msra.mxu0 %v24_v14 }
  0x11   :  { %79 = vmatpush.msra.mxu1 %v40_v15 }
  0x12   :  { %60 = vmatpush.msra.mxu0 %v23_v16 }
  0x13   :  { %80 = vmatpush.msra.mxu1 %v39_v17 }
  0x14   :  { %61 = vmatpush.msra.mxu0 %v22_v18 }
  0x15   :  { %81 = vmatpush.msra.mxu1 %v38_v19 }
  0x16   :  { %62 = vmatpush.msra.mxu0 %v21_v20 }
  0x17   :  { %82 = vmatpush.msra.mxu1 %v37_v21 }
  0x18   :  { %63 = vmatpush.msra.mxu0 %v20_v22 }
  0x19   :  { %83 = vmatpush.msra.mxu1 %v36_v23 }
  0x1a   :  { %64 = vmatpush.msra.mxu0 %v19_v24 }
  0x1b   :  { %84 = vmatpush.msra.mxu1 %v35_v25 }
  0x1c   :  { %65 = vmatpush.msra.mxu0 %v18_v26 }
  0x1d   :  { %85 = vmatpush.msra.mxu1 %v34_v27 }
  0x1e   :  { %66 = vmatpush.msra.mxu0 %v17_v28 }
  0x1f   :  { %86 = vmatpush.msra.mxu1 %v33_v29 }
  0x20   :  { %67 = vmatpush.msra.mxu0 %v16_v30 }
  0x21   :  { %87 = vmatpush.msra.mxu1 %v32_v31  ;;  %68 = vmatmul.f32.vlgmr.msra.gmra.mxu0 %v14_v32 }
  0x22   :  { %88 = vmatmul.f32.vlgmr.msra.gmra.mxu1 %v15_v33 }
  0x9e   :  { %v69_v35 = vpop.f32.mrf.mxu0 }
  0x9f   :  { %v89_v36 = vpop.f32.mrf.mxu1  ;;  %v70_v37 = vadd.f32 %v98_v34, %v69_v35 }
  0xa1   :  { %v90_v38 = vadd.f32 %v89_v36, %v70_v37 }
  0xa3   :  { %v92_v39 = vmax.f32 %v90_v38, 0.0 }
  0xa5   :  { %93 = vst [vmem:[%s230_s3] sm:$0xff] %v92_v39 }

// kernel: autoencoder_forward.12
= control target key start
LH: loop header
LB: loop body
LE: loop exit
PB: predicated region body
PF: predicated region fallthrough
CT: control target
= control target key end

     0   :  { %s745_s1 = inlined_call_operand.vmem [shape: f32[512,256], index: 1, kind: input, shape index: {}]   ;;  %s746_s0 = inlined_call_operand.vmem [shape: f32[8,512], index: 0, kind: input, shape index: {}]   ;;  %s747_s2 = inlined_call_operand.vmem [shape: f32[1,256], index: 2, kind: input, shape index: {}]   ;;  %s748_s3 = inlined_call_operand.vmem [shape: f32[8,256], index: 3, kind: output, shape index: {}]  }
   0x1   :  { %v112_v0 = vld [vmem:[%s745_s1 + $0x2f0] sm:$0xff]  ;;  %v110_v2 = vld [vmem:[%s745_s1 + $0x2e0] sm:$0xff]  ;;  %v113_v62 = vld [vmem:[%s745_s1 + $0x2f8] sm:$0xff] }
   0x2   :  { %v48_v1 = vld [vmem:[%s745_s1 + $0xf0] sm:$0xff]  ;;  %192 = vmatpush.msra.mxu2 %v112_v0  ;;  %v46_v4 = vld [vmem:[%s745_s1 + $0xe0] sm:$0xff]  ;;  %v49_v0 = vld [vmem:[%s745_s1 + $0xf8] sm:$0xff] }
   0x3   :  { %152 = vmatpush.msra.mxu0 %v48_v1  ;;  %v144_v3 = vld [vmem:[%s745_s1 + $0x3f0] sm:$0xff]  ;;  %v142_v7 = vld [vmem:[%s745_s1 + $0x3e0] sm:$0xff]  ;;  %v145_v1 = vld [vmem:[%s745_s1 + $0x3f8] sm:$0xff] }
   0x4   :  { %v80_v5 = vld [vmem:[%s745_s1 + $0x1f0] sm:$0xff]  ;;  %212 = vmatpush.msra.mxu3 %v144_v3  ;;  %193 = vmatpush.msra.mxu2 %v110_v2  ;;  %v78_v9 = vld [vmem:[%s745_s1 + $0x1e0] sm:$0xff]  ;;  %v111_v2 = vld [vmem:[%s745_s1 + $0x2e8] sm:$0xff] }
   0x5   :  { %172 = vmatpush.msra.mxu1 %v80_v5  ;;  %v108_v6 = vld [vmem:[%s745_s1 + $0x2d0] sm:$0xff]  ;;  %153 = vmatpush.msra.mxu0 %v46_v4  ;;  %v106_v11 = vld [vmem:[%s745_s1 + $0x2c0] sm:$0xff]  ;;  %v47_v4 = vld [vmem:[%s745_s1 + $0xe8] sm:$0xff] }
   0x6   :  { %v44_v8 = vld [vmem:[%s745_s1 + $0xd0] sm:$0xff]  ;;  %213 = vmatpush.msra.mxu3 %v142_v7  ;;  %v42_v12 = vld [vmem:[%s745_s1 + $0xc0] sm:$0xff]  ;;  %194 = vmatpush.msra.mxu2 %v108_v6  ;;  %v81_v5 = vld [vmem:[%s745_s1 + $0x1f8] sm:$0xff] }
   0x7   :  { %v140_v10 = vld [vmem:[%s745_s1 + $0x3d0] sm:$0xff]  ;;  %173 = vmatpush.msra.mxu1 %v78_v9  ;;  %154 = vmatpush.msra.mxu0 %v44_v8  ;;  %v138_v14 = vld [vmem:[%s745_s1 + $0x3c0] sm:$0xff]  ;;  %v109_v6 = vld [vmem:[%s745_s1 + $0x2d8] sm:$0xff] }
   0x8   :  { %v76_v13 = vld [vmem:[%s745_s1 + $0x1d0] sm:$0xff]  ;;  %v74_v15 = vld [vmem:[%s745_s1 + $0x1c0] sm:$0xff]  ;;  %214 = vmatpush.msra.mxu3 %v140_v10  ;;  %195 = vmatpush.msra.mxu2 %v106_v11  ;;  %v143_v7 = vld [vmem:[%s745_s1 + $0x3e8] sm:$0xff] }
   0x9   :  { %174 = vmatpush.msra.mxu1 %v76_v13  ;;  %v104_v16 = vld [vmem:[%s745_s1 + $0x2b0] sm:$0xff]  ;;  %155 = vmatpush.msra.mxu0 %v42_v12  ;;  %v102_v20 = vld [vmem:[%s745_s1 + $0x2a0] sm:$0xff]  ;;  %v45_v8 = vld [vmem:[%s745_s1 + $0xd8] sm:$0xff] }
   0xa   :  { %v40_v17 = vld [vmem:[%s745_s1 + $0xb0] sm:$0xff]  ;;  %215 = vmatpush.msra.mxu3 %v138_v14  ;;  %v38_v21 = vld [vmem:[%s745_s1 + $0xa0] sm:$0xff]  ;;  %196 = vmatpush.msra.mxu2 %v104_v16  ;;  %v79_v9 = vld [vmem:[%s745_s1 + $0x1e8] sm:$0xff] }
   0xb   :  { %v136_v18 = vld [vmem:[%s745_s1 + $0x3b0] sm:$0xff]  ;;  %175 = vmatpush.msra.mxu1 %v74_v15  ;;  %156 = vmatpush.msra.mxu0 %v40_v17  ;;  %v134_v22 = vld [vmem:[%s745_s1 + $0x3a0] sm:$0xff]  ;;  %v107_v10 = vld [vmem:[%s745_s1 + $0x2c8] sm:$0xff] }
   0xc   :  { %v72_v19 = vld [vmem:[%s745_s1 + $0x1b0] sm:$0xff]  ;;  %v70_v23 = vld [vmem:[%s745_s1 + $0x1a0] sm:$0xff]  ;;  %216 = vmatpush.msra.mxu3 %v136_v18  ;;  %197 = vmatpush.msra.mxu2 %v102_v20  ;;  %v141_v11 = vld [vmem:[%s745_s1 + $0x3d8] sm:$0xff] }
   0xd   :  { %176 = vmatpush.msra.mxu1 %v72_v19  ;;  %v100_v24 = vld [vmem:[%s745_s1 + $0x290] sm:$0xff]  ;;  %157 = vmatpush.msra.mxu0 %v38_v21  ;;  %v98_v28 = vld [vmem:[%s745_s1 + $0x280] sm:$0xff]  ;;  %v43_v12 = vld [vmem:[%s745_s1 + $0xc8] sm:$0xff] }
   0xe   :  { %v36_v25 = vld [vmem:[%s745_s1 + $0x90] sm:$0xff]  ;;  %217 = vmatpush.msra.mxu3 %v134_v22  ;;  %v34_v29 = vld [vmem:[%s745_s1 + $0x80] sm:$0xff]  ;;  %198 = vmatpush.msra.mxu2 %v100_v24  ;;  %v77_v13 = vld [vmem:[%s745_s1 + $0x1d8] sm:$0xff] }
   0xf   :  { %v132_v26 = vld [vmem:[%s745_s1 + $0x390] sm:$0xff]  ;;  %177 = vmatpush.msra.mxu1 %v70_v23  ;;  %158 = vmatpush.msra.mxu0 %v36_v25  ;;  %v130_v30 = vld [vmem:[%s745_s1 + $0x380] sm:$0xff]  ;;  %v105_v14 = vld [vmem:[%s745_s1 + $0x2b8] sm:$0xff] }
  0x10   :  { %v68_v27 = vld [vmem:[%s745_s1 + $0x190] sm:$0xff]  ;;  %v66_v31 = vld [vmem:[%s745_s1 + $0x180] sm:$0xff]  ;;  %218 = vmatpush.msra.mxu3 %v132_v26  ;;  %199 = vmatpush.msra.mxu2 %v98_v28  ;;  %v139_v15 = vld [vmem:[%s745_s1 + $0x3c8] sm:$0xff] }
  0x11   :  { %178 = vmatpush.msra.mxu1 %v68_v27  ;;  %v96_v32 = vld [vmem:[%s745_s1 + $0x270] sm:$0xff]  ;;  %159 = vmatpush.msra.mxu0 %v34_v29  ;;  %v94_v36 = vld [vmem:[%s745_s1 + $0x260] sm:$0xff]  ;;  %v41_v16 = vld [vmem:[%s745_s1 + $0xb8] sm:$0xff] }
  0x12   :  { %v32_v33 = vld [vmem:[%s745_s1 + $0x70] sm:$0xff]  ;;  %219 = vmatpush.msra.mxu3 %v130_v30  ;;  %v30_v37 = vld [vmem:[%s745_s1 + $0x60] sm:$0xff]  ;;  %200 = vmatpush.msra.mxu2 %v96_v32  ;;  %v75_v17 = vld [vmem:[%s745_s1 + $0x1c8] sm:$0xff] }
  0x13   :  { %v128_v34 = vld [vmem:[%s745_s1 + $0x370] sm:$0xff]  ;;  %179 = vmatpush.msra.mxu1 %v66_v31  ;;  %160 = vmatpush.msra.mxu0 %v32_v33  ;;  %v126_v38 = vld [vmem:[%s745_s1 + $0x360] sm:$0xff]  ;;  %v103_v18 = vld [vmem:[%s745_s1 + $0x2a8] sm:$0xff] }
  0x14   :  { %v64_v35 = vld [vmem:[%s745_s1 + $0x170] sm:$0xff]  ;;  %v62_v39 = vld [vmem:[%s745_s1 + $0x160] sm:$0xff]  ;;  %220 = vmatpush.msra.mxu3 %v128_v34  ;;  %201 = vmatpush.msra.mxu2 %v94_v36  ;;  %v137_v19 = vld [vmem:[%s745_s1 + $0x3b8] sm:$0xff] }
  0x15   :  { %180 = vmatpush.msra.mxu1 %v64_v35  ;;  %v92_v40 = vld [vmem:[%s745_s1 + $0x250] sm:$0xff]  ;;  %161 = vmatpush.msra.mxu0 %v30_v37  ;;  %v90_v44 = vld [vmem:[%s745_s1 + $0x240] sm:$0xff]  ;;  %v39_v20 = vld [vmem:[%s745_s1 + $0xa8] sm:$0xff] }
  0x16   :  { %v28_v41 = vld [vmem:[%s745_s1 + $0x50] sm:$0xff]  ;;  %221 = vmatpush.msra.mxu3 %v126_v38  ;;  %v26_v45 = vld [vmem:[%s745_s1 + $0x40] sm:$0xff]  ;;  %202 = vmatpush.msra.mxu2 %v92_v40  ;;  %v73_v21 = vld [vmem:[%s745_s1 + $0x1b8] sm:$0xff] }
  0x17   :  { %v124_v42 = vld [vmem:[%s745_s1 + $0x350] sm:$0xff]  ;;  %181 = vmatpush.msra.mxu1 %v62_v39  ;;  %162 = vmatpush.msra.mxu0 %v28_v41  ;;  %v122_v46 = vld [vmem:[%s745_s1 + $0x340] sm:$0xff]  ;;  %v101_v22 = vld [vmem:[%s745_s1 + $0x298] sm:$0xff] }
  0x18   :  { %v60_v43 = vld [vmem:[%s745_s1 + $0x150] sm:$0xff]  ;;  %v58_v47 = vld [vmem:[%s745_s1 + $0x140] sm:$0xff]  ;;  %222 = vmatpush.msra.mxu3 %v124_v42  ;;  %203 = vmatpush.msra.mxu2 %v90_v44  ;;  %v135_v23 = vld [vmem:[%s745_s1 + $0x3a8] sm:$0xff] }
  0x19   :  { %182 = vmatpush.msra.mxu1 %v60_v43  ;;  %v88_v48 = vld [vmem:[%s745_s1 + $0x230] sm:$0xff]  ;;  %163 = vmatpush.msra.mxu0 %v26_v45  ;;  %v86_v52 = vld [vmem:[%s745_s1 + $0x220] sm:$0xff]  ;;  %v37_v24 = vld [vmem:[%s745_s1 + $0x98] sm:$0xff] }
  0x1a   :  { %v24_v49 = vld [vmem:[%s745_s1 + $0x30] sm:$0xff]  ;;  %223 = vmatpush.msra.mxu3 %v122_v46  ;;  %v22_v53 = vld [vmem:[%s745_s1 + $0x20] sm:$0xff]  ;;  %204 = vmatpush.msra.mxu2 %v88_v48  ;;  %v71_v25 = vld [vmem:[%s745_s1 + $0x1a8] sm:$0xff] }
  0x1b   :  { %v120_v50 = vld [vmem:[%s745_s1 + $0x330] sm:$0xff]  ;;  %183 = vmatpush.msra.mxu1 %v58_v47  ;;  %164 = vmatpush.msra.mxu0 %v24_v49  ;;  %v118_v54 = vld [vmem:[%s745_s1 + $0x320] sm:$0xff]  ;;  %v99_v26 = vld [vmem:[%s745_s1 + $0x288] sm:$0xff] }
  0x1c   :  { %v56_v51 = vld [vmem:[%s745_s1 + $0x130] sm:$0xff]  ;;  %v54_v55 = vld [vmem:[%s745_s1 + $0x120] sm:$0xff]  ;;  %224 = vmatpush.msra.mxu3 %v120_v50  ;;  %205 = vmatpush.msra.mxu2 %v86_v52  ;;  %v133_v27 = vld [vmem:[%s745_s1 + $0x398] sm:$0xff] }
  0x1d   :  { %184 = vmatpush.msra.mxu1 %v56_v51  ;;  %v84_v56 = vld [vmem:[%s745_s1 + $0x210] sm:$0xff]  ;;  %165 = vmatpush.msra.mxu0 %v22_v53  ;;  %v82_v60 = vld [vmem:[%s745_s1 + $0x200] sm:$0xff]  ;;  %v35_v28 = vld [vmem:[%s745_s1 + $0x88] sm:$0xff] }
  0x1e   :  { %v20_v57 = vld [vmem:[%s745_s1 + $0x10] sm:$0xff]  ;;  %225 = vmatpush.msra.mxu3 %v118_v54  ;;  %v18_v61 = vld [vmem:[%s745_s1] sm:$0xff]  ;;  %206 = vmatpush.msra.mxu2 %v84_v56  ;;  %v69_v29 = vld [vmem:[%s745_s1 + $0x198] sm:$0xff] }
  0x1f   :  { %v116_v58 = vld [vmem:[%s745_s1 + $0x310] sm:$0xff]  ;;  %185 = vmatpush.msra.mxu1 %v54_v55  ;;  %166 = vmatpush.msra.mxu0 %v20_v57  ;;  %v114_v63 = vld [vmem:[%s745_s1 + $0x300] sm:$0xff]  ;;  %v97_v30 = vld [vmem:[%s745_s1 + $0x278] sm:$0xff] }
  0x20   :  { %v52_v59 = vld [vmem:[%s745_s1 + $0x110] sm:$0xff]  ;;  %226 = vmatpush.msra.mxu3 %v116_v58  ;;  %207 = vmatpush.msra.mxu2 %v82_v60  ;;  %v50_v3 = vld [vmem:[%s745_s1 + $0x100] sm:$0xff]  ;;  %v131_v31 = vld [vmem:[%s745_s1 + $0x388] sm:$0xff] }
  0x21   :  { %186 = vmatpush.msra.mxu1 %v52_v59  ;;  %167 = vmatpush.msra.mxu0 %v18_v61  ;;  %v33_v32 = vld [vmem:[%s745_s1 + $0x78] sm:$0xff]  ;;  %v67_v33 = vld [vmem:[%s745_s1 + $0x188] sm:$0xff]  ;;  %v16_v44 = vld [vmem:[%s746_s0 + $0x10] sm:$0xff] }
  0x22   :  { %272 = vmatpush.msrb.mxu2 %v113_v62  ;;  %227 = vmatpush.msra.mxu3 %v114_v63  ;;  %v95_v34 = vld [vmem:[%s745_s1 + $0x268] sm:$0xff]  ;;  %v129_v35 = vld [vmem:[%s745_s1 + $0x378] sm:$0xff]  ;;  %v14_v49 = vld [vmem:[%s746_s0] sm:$0xff] }
  0x23   :  { %232 = vmatpush.msrb.mxu0 %v49_v0  ;;  %187 = vmatpush.msra.mxu1 %v50_v3  ;;  %v31_v36 = vld [vmem:[%s745_s1 + $0x68] sm:$0xff]  ;;  %v65_v37 = vld [vmem:[%s745_s1 + $0x178] sm:$0xff] }
  0x24   :  { %292 = vmatpush.msrb.mxu3 %v145_v1  ;;  %273 = vmatpush.msrb.mxu2 %v111_v2  ;;  %v93_v38 = vld [vmem:[%s745_s1 + $0x258] sm:$0xff]  ;;  %v127_v39 = vld [vmem:[%s745_s1 + $0x368] sm:$0xff] }
  0x25   :  { %233 = vmatpush.msrb.mxu0 %v47_v4  ;;  %252 = vmatpush.msrb.mxu1 %v81_v5  ;;  %v29_v40 = vld [vmem:[%s745_s1 + $0x58] sm:$0xff]  ;;  %v63_v41 = vld [vmem:[%s745_s1 + $0x168] sm:$0xff]  ;;  %v146_v4 = vld [vmem:[%s747_s2] sm:$0x3] }
  0x26   :  { %274 = vmatpush.msrb.mxu2 %v109_v6  ;;  %293 = vmatpush.msrb.mxu3 %v143_v7  ;;  %v91_v42 = vld [vmem:[%s745_s1 + $0x248] sm:$0xff]  ;;  %v125_v43 = vld [vmem:[%s745_s1 + $0x358] sm:$0xff]  ;;  %v148_v5 = vperm.slane %v146_v4, 0 }
  0x27   :  { %234 = vmatpush.msrb.mxu0 %v45_v8  ;;  %253 = vmatpush.msrb.mxu1 %v79_v9  ;;  %v27_v45 = vld [vmem:[%s745_s1 + $0x48] sm:$0xff]  ;;  %v61_v46 = vld [vmem:[%s745_s1 + $0x158] sm:$0xff] }
  0x28   :  { %275 = vmatpush.msrb.mxu2 %v107_v10  ;;  %294 = vmatpush.msrb.mxu3 %v141_v11  ;;  %v89_v47 = vld [vmem:[%s745_s1 + $0x238] sm:$0xff]  ;;  %v123_v48 = vld [vmem:[%s745_s1 + $0x348] sm:$0xff] }
  0x29   :  { %235 = vmatpush.msrb.mxu0 %v43_v12  ;;  %254 = vmatpush.msrb.mxu1 %v77_v13  ;;  %v17_v50 = vld [vmem:[%s746_s0 + $0x18] sm:$0xff]  ;;  %v59_v52 = vld [vmem:[%s745_s1 + $0x148] sm:$0xff]  ;;  %v149_v13 = vperm.slane %v146_v4, 1 }
  0x2a   :  { %276 = vmatpush.msrb.mxu2 %v105_v14  ;;  %295 = vmatpush.msrb.mxu3 %v139_v15  ;;  %v25_v51 = vld [vmem:[%s745_s1 + $0x38] sm:$0xff]  ;;  %v87_v53 = vld [vmem:[%s745_s1 + $0x228] sm:$0xff] }
  0x2b   :  { %236 = vmatpush.msrb.mxu0 %v41_v16  ;;  %255 = vmatpush.msrb.mxu1 %v75_v17  ;;  %v121_v54 = vld [vmem:[%s745_s1 + $0x338] sm:$0xff]  ;;  %v15_v55 = vld [vmem:[%s746_s0 + $0x8] sm:$0xff] }
  0x2c   :  { %277 = vmatpush.msrb.mxu2 %v103_v18  ;;  %296 = vmatpush.msrb.mxu3 %v137_v19  ;;  %v23_v56 = vld [vmem:[%s745_s1 + $0x28] sm:$0xff]  ;;  %v57_v57 = vld [vmem:[%s745_s1 + $0x138] sm:$0xff] }
  0x2d   :  { %237 = vmatpush.msrb.mxu0 %v39_v20  ;;  %256 = vmatpush.msrb.mxu1 %v73_v21  ;;  %v85_v58 = vld [vmem:[%s745_s1 + $0x218] sm:$0xff]  ;;  %v119_v59 = vld [vmem:[%s745_s1 + $0x328] sm:$0xff] }
  0x2e   :  { %278 = vmatpush.msrb.mxu2 %v101_v22  ;;  %297 = vmatpush.msrb.mxu3 %v135_v23  ;;  %v21_v60 = vld [vmem:[%s745_s1 + $0x18] sm:$0xff]  ;;  %v55_v61 = vld [vmem:[%s745_s1 + $0x128] sm:$0xff] }
  0x2f   :  { %238 = vmatpush.msrb.mxu0 %v37_v24  ;;  %257 = vmatpush.msrb.mxu1 %v71_v25  ;;  %v83_v62 = vld [vmem:[%s745_s1 + $0x208] sm:$0xff]  ;;  %v117_v63 = vld [vmem:[%s745_s1 + $0x318] sm:$0xff] }
  0x30   :  { %279 = vmatpush.msrb.mxu2 %v99_v26  ;;  %298 = vmatpush.msrb.mxu3 %v133_v27  ;;  %v19_v0 = vld [vmem:[%s745_s1 + $0x8] sm:$0xff]  ;;  %v53_v1 = vld [vmem:[%s745_s1 + $0x118] sm:$0xff] }
  0x31   :  { %239 = vmatpush.msrb.mxu0 %v35_v28  ;;  %258 = vmatpush.msrb.mxu1 %v69_v29  ;;  %v115_v2 = vld [vmem:[%s745_s1 + $0x308] sm:$0xff] }
  0x32   :  { %280 = vmatpush.msrb.mxu2 %v97_v30  ;;  %299 = vmatpush.msrb.mxu3 %v131_v31  ;;  %v51_v3 = vld [vmem:[%s745_s1 + $0x108] sm:$0xff] }
  0x33   :  { %240 = vmatpush.msrb.mxu0 %v33_v32  ;;  %259 = vmatpush.msrb.mxu1 %v67_v33 }
  0x34   :  { %281 = vmatpush.msrb.mxu2 %v95_v34  ;;  %300 = vmatpush.msrb.mxu3 %v129_v35 }
  0x35   :  { %241 = vmatpush.msrb.mxu0 %v31_v36  ;;  %260 = vmatpush.msrb.mxu1 %v65_v37 }
  0x36   :  { %282 = vmatpush.msrb.mxu2 %v93_v38  ;;  %301 = vmatpush.msrb.mxu3 %v127_v39 }
  0x37   :  { %242 = vmatpush.msrb.mxu0 %v29_v40  ;;  %261 = vmatpush.msrb.mxu1 %v63_v41 }
  0x38   :  { %283 = vmatpush.msrb.mxu2 %v91_v42  ;;  %302 = vmatpush.msrb.mxu3 %v125_v43 }
  0x39   :  { %208 = vmatmul.f32.vlgmr.msra.gmra.mxu2 %v16_v44  ;;  %243 = vmatpush.msrb.mxu0 %v27_v45 }
  0x3a   :  { %262 = vmatpush.msrb.mxu1 %v61_v46  ;;  %284 = vmatpush.msrb.mxu2 %v89_v47 }
  0x3b   :  { %303 = vmatpush.msrb.mxu3 %v123_v48  ;;  %168 = vmatmul.f32.vlgmr.msra.gmra.mxu0 %v14_v49 }
  0x3c   :  { %228 = vmatmul.f32.vlgmr.msra.gmra.mxu3 %v17_v50  ;;  %244 = vmatpush.msrb.mxu0 %v25_v51 }
  0x3d   :  { %263 = vmatpush.msrb.mxu1 %v59_v52  ;;  %285 = vmatpush.msrb.mxu2 %v87_v53 }
  0x3e   :  { %304 = vmatpush.msrb.mxu3 %v121_v54  ;;  %188 = vmatmul.f32.vlgmr.msra.gmra.mxu1 %v15_v55 }
  0x3f   :  { %245 = vmatpush.msrb.mxu0 %v23_v56  ;;  %264 = vmatpush.msrb.mxu1 %v57_v57 }
  0x40   :  { %286 = vmatpush.msrb.mxu2 %v85_v58  ;;  %305 = vmatpush.msrb.mxu3 %v119_v59 }
  0x41   :  { %246 = vmatpush.msrb.mxu0 %v21_v60  ;;  %265 = vmatpush.msrb.mxu1 %v55_v61 }
  0x42   :  { %287 = vmatpush.msrb.mxu2 %v83_v62  ;;  %306 = vmatpush.msrb.mxu3 %v117_v63 }
  0x43   :  { %288 = vmatmul.f32.vlgmr.msrb.gmra.mxu2 %v16_v44  ;;  %247 = vmatpush.msrb.mxu0 %v19_v0 }
  0x44   :  { %266 = vmatpush.msrb.mxu1 %v53_v1  ;;  %307 = vmatpush.msrb.mxu3 %v115_v2 }
  0x45   :  { %248 = vmatmul.f32.vlgmr.msrb.gmra.mxu0 %v14_v49  ;;  %308 = vmatmul.f32.vlgmr.msrb.gmra.mxu3 %v17_v50 }
  0x46   :  { %267 = vmatpush.msrb.mxu1 %v51_v3 }
  0x47   :  { %268 = vmatmul.f32.vlgmr.msrb.gmra.mxu1 %v15_v55 }
  0xb8   :  { %v169_v6 = vpop.f32.mrf.mxu0 }
  0xb9   :  { %v170_v7 = vadd.f32 %v169_v6, %v148_v5 }
  0xbb   :  { %v189_v8 = vpop.f32.mrf.mxu1 }
  0xbc   :  { %v190_v9 = vadd.f32 %v189_v8, %v170_v7  ;;  %v209_v10 = vpop.f32.mrf.mxu2 }
  0xbe   :  { %v210_v11 = vadd.f32 %v209_v10, %v190_v9 }
  0xbf   :  { %v229_v12 = vpop.f32.mrf.mxu3 }
  0xc0   :  { %v230_v14 = vadd.f32 %v229_v12, %v210_v11 }
  0xc2   :  { %v312_v15 = vmax.f32 %v230_v14, 0.0  ;;  %v249_v16 = vpop.f32.mrf.mxu0 }
  0xc3   :  { %v250_v17 = vadd.f32 %v249_v16, %v149_v13 }
  0xc4   :  { %314 = vst [vmem:[%s748_s3] sm:$0xff] %v312_v15  ;;  %v269_v18 = vpop.f32.mrf.mxu1 }
  0xc5   :  { %v270_v19 = vadd.f32 %v269_v18, %v250_v17 }
  0xc6   :  { %v289_v20 = vpop.f32.mrf.mxu2 }
  0xc7   :  { %v290_v21 = vadd.f32 %v289_v20, %v270_v19 }
  0xc8   :  { %v309_v22 = vpop.f32.mrf.mxu3 }
  0xc9   :  { %v310_v23 = vadd.f32 %v309_v22, %v290_v21 }
  0xcb   :  { %v313_v24 = vmax.f32 %v310_v23, 0.0 }
  0xcd   :  { %315 = vst [vmem:[%s748_s3 + $0x8] sm:$0xff] %v313_v24 }

// kernel: autoencoder_forward.14
= control target key start
LH: loop header
LB: loop body
LE: loop exit
PB: predicated region body
PF: predicated region fallthrough
CT: control target
= control target key end

     0   :  { %s223_s1 = inlined_call_operand.vmem [shape: f32[128,128], index: 1, kind: input, shape index: {}]   ;;  %s224_s2 = inlined_call_operand.vmem [shape: f32[1,128], index: 2, kind: input, shape index: {}]   ;;  %s225_s0 = inlined_call_operand.vmem [shape: f32[32,128], index: 0, kind: input, shape index: {}]   ;;  %s226_s3 = inlined_call_operand.vmem [shape: f32[32,128], index: 3, kind: output, shape index: {}]  }
   0x1   :  { %v33_v0 = vld [vmem:[%s223_s1 + $0x78] sm:$0xff]  ;;  %v32_v1 = vld [vmem:[%s223_s1 + $0x70] sm:$0xff]  ;;  %v31_v2 = vld [vmem:[%s223_s1 + $0x68] sm:$0xff] }
   0x2   :  { %80 = vmatpush.msra.mxu2 %v33_v0  ;;  %81 = vmatpush.msra.mxu3 %v33_v0  ;;  %v30_v3 = vld [vmem:[%s223_s1 + $0x60] sm:$0xff]  ;;  %v29_v4 = vld [vmem:[%s223_s1 + $0x58] sm:$0xff]  ;;  %v28_v5 = vld [vmem:[%s223_s1 + $0x50] sm:$0xff] }
   0x3   :  { %38 = vmatpush.msra.mxu0 %v33_v0  ;;  %79 = vmatpush.msra.mxu1 %v33_v0  ;;  %v27_v6 = vld [vmem:[%s223_s1 + $0x48] sm:$0xff]  ;;  %v26_v7 = vld [vmem:[%s223_s1 + $0x40] sm:$0xff]  ;;  %v25_v8 = vld [vmem:[%s223_s1 + $0x38] sm:$0xff] }
   0x4   :  { %83 = vmatpush.msra.mxu2 %v32_v1  ;;  %84 = vmatpush.msra.mxu3 %v32_v1  ;;  %v24_v9 = vld [vmem:[%s223_s1 + $0x30] sm:$0xff]  ;;  %v23_v10 = vld [vmem:[%s223_s1 + $0x28] sm:$0xff]  ;;  %v22_v11 = vld [vmem:[%s223_s1 + $0x20] sm:$0xff] }
   0x5   :  { %39 = vmatpush.msra.mxu0 %v32_v1  ;;  %82 = vmatpush.msra.mxu1 %v32_v1  ;;  %v21_v12 = vld [vmem:[%s223_s1 + $0x18] sm:$0xff]  ;;  %v20_v13 = vld [vmem:[%s223_s1 + $0x10] sm:$0xff]  ;;  %v19_v14 = vld [vmem:[%s223_s1 + $0x8] sm:$0xff] }
   0x6   :  { %86 = vmatpush.msra.mxu2 %v31_v2  ;;  %87 = vmatpush.msra.mxu3 %v31_v2  ;;  %v18_v15 = vld [vmem:[%s223_s1] sm:$0xff]  ;;  %v16_v16 = vld [vmem:[%s225_s0 + $0x10] sm:$0xff]  ;;  %v17_v17 = vld [vmem:[%s225_s0 + $0x18] sm:$0xff] }
   0x7   :  { %40 = vmatpush.msra.mxu0 %v31_v2  ;;  %85 = vmatpush.msra.mxu1 %v31_v2  ;;  %v14_v18 = vld [vmem:[%s225_s0] sm:$0xff]  ;;  %v15_v19 = vld [vmem:[%s225_s0 + $0x8] sm:$0xff] }
   0x8   :  { %89 = vmatpush.msra.mxu2 %v30_v3  ;;  %90 = vmatpush.msra.mxu3 %v30_v3  ;;  %v127_v20 = vld [vmem:[%s224_s2] ss:$0 sm:$0xff] }
   0x9   :  { %41 = vmatpush.msra.mxu0 %v30_v3  ;;  %88 = vmatpush.msra.mxu1 %v30_v3 }
   0xa   :  { %92 = vmatpush.msra.mxu2 %v29_v4  ;;  %93 = vmatpush.msra.mxu3 %v29_v4 }
   0xb   :  { %42 = vmatpush.msra.mxu0 %v29_v4  ;;  %91 = vmatpush.msra.mxu1 %v29_v4 }
   0xc   :  { %95 = vmatpush.msra.mxu2 %v28_v5  ;;  %96 = vmatpush.msra.mxu3 %v28_v5 }
   0xd   :  { %43 = vmatpush.msra.mxu0 %v28_v5  ;;  %94 = vmatpush.msra.mxu1 %v28_v5 }
   0xe   :  { %98 = vmatpush.msra.mxu2 %v27_v6  ;;  %99 = vmatpush.msra.mxu3 %v27_v6 }
   0xf   :  { %44 = vmatpush.msra.mxu0 %v27_v6  ;;  %97 = vmatpush.msra.mxu1 %v27_v6 }
  0x10   :  { %101 = vmatpush.msra.mxu2 %v26_v7  ;;  %102 = vmatpush.msra.mxu3 %v26_v7 }
  0x11   :  { %45 = vmatpush.msra.mxu0 %v26_v7  ;;  %100 = vmatpush.msra.mxu1 %v26_v7 }
  0x12   :  { %104 = vmatpush.msra.mxu2 %v25_v8  ;;  %105 = vmatpush.msra.mxu3 %v25_v8 }
  0x13   :  { %46 = vmatpush.msra.mxu0 %v25_v8  ;;  %103 = vmatpush.msra.mxu1 %v25_v8 }
  0x14   :  { %107 = vmatpush.msra.mxu2 %v24_v9  ;;  %108 = vmatpush.msra.mxu3 %v24_v9 }
  0x15   :  { %47 = vmatpush.msra.mxu0 %v24_v9  ;;  %106 = vmatpush.msra.mxu1 %v24_v9 }
  0x16   :  { %110 = vmatpush.msra.mxu2 %v23_v10  ;;  %111 = vmatpush.msra.mxu3 %v23_v10 }
  0x17   :  { %48 = vmatpush.msra.mxu0 %v23_v10  ;;  %109 = vmatpush.msra.mxu1 %v23_v10 }
  0x18   :  { %113 = vmatpush.msra.mxu2 %v22_v11  ;;  %114 = vmatpush.msra.mxu3 %v22_v11 }
  0x19   :  { %49 = vmatpush.msra.mxu0 %v22_v11  ;;  %112 = vmatpush.msra.mxu1 %v22_v11 }
  0x1a   :  { %116 = vmatpush.msra.mxu2 %v21_v12  ;;  %117 = vmatpush.msra.mxu3 %v21_v12 }
  0x1b   :  { %50 = vmatpush.msra.mxu0 %v21_v12  ;;  %115 = vmatpush.msra.mxu1 %v21_v12 }
  0x1c   :  { %119 = vmatpush.msra.mxu2 %v20_v13  ;;  %120 = vmatpush.msra.mxu3 %v20_v13 }
  0x1d   :  { %51 = vmatpush.msra.mxu0 %v20_v13  ;;  %118 = vmatpush.msra.mxu1 %v20_v13 }
  0x1e   :  { %122 = vmatpush.msra.mxu2 %v19_v14  ;;  %123 = vmatpush.msra.mxu3 %v19_v14 }
  0x1f   :  { %52 = vmatpush.msra.mxu0 %v19_v14  ;;  %121 = vmatpush.msra.mxu1 %v19_v14 }
  0x20   :  { %125 = vmatpush.msra.mxu2 %v18_v15  ;;  %126 = vmatpush.msra.mxu3 %v18_v15 }
  0x21   :  { %60 = vmatmul.f32.vlgmr.msra.gmra.mxu2 %v16_v16  ;;  %63 = vmatmul.f32.vlgmr.msra.gmra.mxu3 %v17_v17 }
  0x22   :  { %53 = vmatpush.msra.mxu0 %v18_v15  ;;  %124 = vmatpush.msra.mxu1 %v18_v15 }
  0x23   :  { %54 = vmatmul.f32.vlgmr.msra.gmra.mxu0 %v14_v18  ;;  %57 = vmatmul.f32.vlgmr.msra.gmra.mxu1 %v15_v19 }
  0xa0   :  { %v55_v21 = vpop.f32.mrf.mxu0  ;;  %v58_v22 = vpop.f32.mrf.mxu1 }
  0xa1   :  { %v56_v23 = vadd.f32 %v127_v20, %v55_v21  ;;  %v59_v24 = vadd.f32 %v127_v20, %v58_v22 }
  0xa3   :  { %v67_v25 = vmax.f32 %v56_v23, 0.0  ;;  %v68_v26 = vmax.f32 %v59_v24, 0.0 }
  0xa4   :  { %v61_v27 = vpop.f32.mrf.mxu2  ;;  %v64_v28 = vpop.f32.mrf.mxu3 }
  0xa5   :  { %71 = vst [vmem:[%s226_s3] sm:$0xff] %v67_v25  ;;  %v62_v29 = vadd.f32 %v127_v20, %v61_v27  ;;  %v65_v30 = vadd.f32 %v127_v20, %v64_v28 }
  0xa6   :  { %72 = vst [vmem:[%s226_s3 + $0x8] sm:$0xff] %v68_v26 }
  0xa7   :  { %v69_v31 = vmax.f32 %v62_v29, 0.0  ;;  %v70_v32 = vmax.f32 %v65_v30, 0.0 }
  0xa9   :  { %73 = vst [vmem:[%s226_s3 + $0x10] sm:$0xff] %v69_v31 }
  0xaa   :  { %74 = vst [vmem:[%s226_s3 + $0x18] sm:$0xff] %v70_v32 }

// kernel: autoencoder_forward.15
= control target key start
LH: loop header
LB: loop body
LE: loop exit
PB: predicated region body
PF: predicated region fallthrough
CT: control target
= control target key end

     0   :  { %s465_s1 = inlined_call_operand.vmem [shape: f32[128,128], index: 1, kind: input, shape index: {}]   ;;  %s466_s2 = inlined_call_operand.vmem [shape: f32[1,128], index: 2, kind: input, shape index: {}]   ;;  %s467_s0 = inlined_call_operand.vmem [shape: f32[128,128], index: 0, kind: input, shape index: {}]   ;;  %s468_s3 = inlined_call_operand.vmem [shape: f32[128,128], index: 3, kind: output, shape index: {}]  }
   0x1   :  { %v45_v0 = vld [vmem:[%s465_s1 + $0x78] sm:$0xff]  ;;  %v44_v1 = vld [vmem:[%s465_s1 + $0x70] sm:$0xff]  ;;  %v43_v2 = vld [vmem:[%s465_s1 + $0x68] sm:$0xff] }
   0x2   :  { %200 = vmatpush.msra.mxu2 %v45_v0  ;;  %201 = vmatpush.msra.mxu3 %v45_v0  ;;  %v42_v3 = vld [vmem:[%s465_s1 + $0x60] sm:$0xff]  ;;  %v41_v4 = vld [vmem:[%s465_s1 + $0x58] sm:$0xff]  ;;  %v40_v5 = vld [vmem:[%s465_s1 + $0x50] sm:$0xff] }
   0x3   :  { %50 = vmatpush.msra.mxu0 %v45_v0  ;;  %199 = vmatpush.msra.mxu1 %v45_v0  ;;  %v39_v6 = vld [vmem:[%s465_s1 + $0x48] sm:$0xff]  ;;  %v38_v7 = vld [vmem:[%s465_s1 + $0x40] sm:$0xff]  ;;  %v37_v8 = vld [vmem:[%s465_s1 + $0x38] sm:$0xff] }
   0x4   :  { %203 = vmatpush.msra.mxu2 %v44_v1  ;;  %204 = vmatpush.msra.mxu3 %v44_v1  ;;  %v36_v9 = vld [vmem:[%s465_s1 + $0x30] sm:$0xff]  ;;  %v35_v10 = vld [vmem:[%s465_s1 + $0x28] sm:$0xff]  ;;  %v34_v11 = vld [vmem:[%s465_s1 + $0x20] sm:$0xff] }
   0x5   :  { %51 = vmatpush.msra.mxu0 %v44_v1  ;;  %202 = vmatpush.msra.mxu1 %v44_v1  ;;  %v33_v12 = vld [vmem:[%s465_s1 + $0x18] sm:$0xff]  ;;  %v32_v13 = vld [vmem:[%s465_s1 + $0x10] sm:$0xff]  ;;  %v31_v14 = vld [vmem:[%s465_s1 + $0x8] sm:$0xff] }
   0x6   :  { %206 = vmatpush.msra.mxu2 %v43_v2  ;;  %207 = vmatpush.msra.mxu3 %v43_v2  ;;  %v30_v15 = vld [vmem:[%s465_s1] sm:$0xff]  ;;  %v23_v20 = vld [vmem:[%s467_s0 + $0x48] sm:$0xff]  ;;  %v24_v24 = vld [vmem:[%s467_s0 + $0x50] sm:$0xff] }
   0x7   :  { %52 = vmatpush.msra.mxu0 %v43_v2  ;;  %205 = vmatpush.msra.mxu1 %v43_v2  ;;  %v22_v16 = vld [vmem:[%s467_s0 + $0x40] sm:$0xff]  ;;  %v27_v21 = vld [vmem:[%s467_s0 + $0x68] sm:$0xff]  ;;  %v28_v25 = vld [vmem:[%s467_s0 + $0x70] sm:$0xff] }
   0x8   :  { %209 = vmatpush.msra.mxu2 %v42_v3  ;;  %210 = vmatpush.msra.mxu3 %v42_v3  ;;  %v26_v17 = vld [vmem:[%s467_s0 + $0x60] sm:$0xff]  ;;  %v15_v22 = vld [vmem:[%s467_s0 + $0x8] sm:$0xff]  ;;  %v16_v26 = vld [vmem:[%s467_s0 + $0x10] sm:$0xff] }
   0x9   :  { %53 = vmatpush.msra.mxu0 %v42_v3  ;;  %208 = vmatpush.msra.mxu1 %v42_v3  ;;  %v14_v18 = vld [vmem:[%s467_s0] sm:$0xff]  ;;  %v19_v23 = vld [vmem:[%s467_s0 + $0x28] sm:$0xff]  ;;  %v20_v27 = vld [vmem:[%s467_s0 + $0x30] sm:$0xff] }
   0xa   :  { %212 = vmatpush.msra.mxu2 %v41_v4  ;;  %213 = vmatpush.msra.mxu3 %v41_v4  ;;  %v18_v19 = vld [vmem:[%s467_s0 + $0x20] sm:$0xff]  ;;  %v25_v28 = vld [vmem:[%s467_s0 + $0x58] sm:$0xff] }
   0xb   :  { %54 = vmatpush.msra.mxu0 %v41_v4  ;;  %211 = vmatpush.msra.mxu1 %v41_v4  ;;  %v29_v29 = vld [vmem:[%s467_s0 + $0x78] sm:$0xff]  ;;  %v399_v32 = vld [vmem:[%s466_s2] ss:$0 sm:$0xff] }
   0xc   :  { %215 = vmatpush.msra.mxu2 %v40_v5  ;;  %216 = vmatpush.msra.mxu3 %v40_v5  ;;  %v17_v30 = vld [vmem:[%s467_s0 + $0x18] sm:$0xff] }
   0xd   :  { %55 = vmatpush.msra.mxu0 %v40_v5  ;;  %214 = vmatpush.msra.mxu1 %v40_v5  ;;  %v21_v31 = vld [vmem:[%s467_s0 + $0x38] sm:$0xff] }
   0xe   :  { %218 = vmatpush.msra.mxu2 %v39_v6  ;;  %219 = vmatpush.msra.mxu3 %v39_v6 }
   0xf   :  { %56 = vmatpush.msra.mxu0 %v39_v6  ;;  %217 = vmatpush.msra.mxu1 %v39_v6 }
  0x10   :  { %221 = vmatpush.msra.mxu2 %v38_v7  ;;  %222 = vmatpush.msra.mxu3 %v38_v7 }
  0x11   :  { %57 = vmatpush.msra.mxu0 %v38_v7  ;;  %220 = vmatpush.msra.mxu1 %v38_v7 }
  0x12   :  { %224 = vmatpush.msra.mxu2 %v37_v8  ;;  %225 = vmatpush.msra.mxu3 %v37_v8 }
  0x13   :  { %58 = vmatpush.msra.mxu0 %v37_v8  ;;  %223 = vmatpush.msra.mxu1 %v37_v8 }
  0x14   :  { %227 = vmatpush.msra.mxu2 %v36_v9  ;;  %228 = vmatpush.msra.mxu3 %v36_v9 }
  0x15   :  { %59 = vmatpush.msra.mxu0 %v36_v9  ;;  %226 = vmatpush.msra.mxu1 %v36_v9 }
  0x16   :  { %230 = vmatpush.msra.mxu2 %v35_v10  ;;  %231 = vmatpush.msra.mxu3 %v35_v10 }
  0x17   :  { %60 = vmatpush.msra.mxu0 %v35_v10  ;;  %229 = vmatpush.msra.mxu1 %v35_v10 }
  0x18   :  { %233 = vmatpush.msra.mxu2 %v34_v11  ;;  %234 = vmatpush.msra.mxu3 %v34_v11 }
  0x19   :  { %61 = vmatpush.msra.mxu0 %v34_v11  ;;  %232 = vmatpush.msra.mxu1 %v34_v11 }
  0x1a   :  { %236 = vmatpush.msra.mxu2 %v33_v12  ;;  %237 = vmatpush.msra.mxu3 %v33_v12 }
  0x1b   :  { %62 = vmatpush.msra.mxu0 %v33_v12  ;;  %235 = vmatpush.msra.mxu1 %v33_v12 }
  0x1c   :  { %239 = vmatpush.msra.mxu2 %v32_v13  ;;  %240 = vmatpush.msra.mxu3 %v32_v13 }
  0x1d   :  { %63 = vmatpush.msra.mxu0 %v32_v13  ;;  %238 = vmatpush.msra.mxu1 %v32_v13 }
  0x1e   :  { %242 = vmatpush.msra.mxu2 %v31_v14  ;;  %243 = vmatpush.msra.mxu3 %v31_v14 }
  0x1f   :  { %64 = vmatpush.msra.mxu0 %v31_v14  ;;  %241 = vmatpush.msra.mxu1 %v31_v14 }
  0x20   :  { %245 = vmatpush.msra.mxu2 %v30_v15  ;;  %246 = vmatpush.msra.mxu3 %v30_v15 }
  0x21   :  { %90 = vmatmul.f32.vlgmr.msra.gmra.mxu2 %v22_v16  ;;  %102 = vmatmul.f32.vlgmr.msra.gmra.mxu3 %v26_v17 }
  0x22   :  { %65 = vmatpush.msra.mxu0 %v30_v15  ;;  %244 = vmatpush.msra.mxu1 %v30_v15 }
  0x23   :  { %66 = vmatmul.f32.vlgmr.msra.gmra.mxu0 %v14_v18  ;;  %78 = vmatmul.f32.vlgmr.msra.gmra.mxu1 %v18_v19 }
  0x29   :  { %93 = vmatmul.f32.gmra.mxu2 %v23_v20  ;;  %105 = vmatmul.f32.gmra.mxu3 %v27_v21 }
  0x2b   :  { %69 = vmatmul.f32.gmra.mxu0 %v15_v22  ;;  %81 = vmatmul.f32.gmra.mxu1 %v19_v23 }
  0x31   :  { %96 = vmatmul.f32.gmra.mxu2 %v24_v24  ;;  %108 = vmatmul.f32.gmra.mxu3 %v28_v25 }
  0x33   :  { %72 = vmatmul.f32.gmra.mxu0 %v16_v26  ;;  %84 = vmatmul.f32.gmra.mxu1 %v20_v27 }
  0x39   :  { %99 = vmatmul.f32.gmra.mxu2 %v25_v28  ;;  %111 = vmatmul.f32.gmra.mxu3 %v29_v29 }
  0x3b   :  { %75 = vmatmul.f32.gmra.mxu0 %v17_v30  ;;  %87 = vmatmul.f32.gmra.mxu1 %v21_v31 }
  0xa0   :  { %v67_v33 = vpop.f32.mrf.mxu0  ;;  %v79_v34 = vpop.f32.mrf.mxu1 }
  0xa1   :  { %v68_v35 = vadd.f32 %v399_v32, %v67_v33  ;;  %v80_v36 = vadd.f32 %v399_v32, %v79_v34 }
  0xa3   :  { %v115_v37 = vmul.f32 0.5, %v68_v35  ;;  %v119_v38 = vmul.f32 0.5, %v80_v36 }
  0xa4   :  { %v91_v39 = vpop.f32.mrf.mxu2  ;;  %v103_v40 = vpop.f32.mrf.mxu3 }
  0xa5   :  { %248 = vtanh.f32 %v115_v37  ;;  %v92_v41 = vadd.f32 %v399_v32, %v91_v39  ;;  %v104_v42 = vadd.f32 %v399_v32, %v103_v40 }
  0xa6   :  { %250 = vtanh.f32 %v119_v38 }
  0xa7   :  { %v123_v43 = vmul.f32 0.5, %v92_v41  ;;  %v127_v44 = vmul.f32 0.5, %v104_v42 }
  0xa8   :  { %v70_v45 = vpop.f32.mrf.mxu0  ;;  %v82_v46 = vpop.f32.mrf.mxu1 }
  0xa9   :  { %252 = vtanh.f32 %v123_v43  ;;  %v71_v47 = vadd.f32 %v399_v32, %v70_v45  ;;  %v83_v48 = vadd.f32 %v399_v32, %v82_v46 }
  0xaa   :  { %254 = vtanh.f32 %v127_v44 }
  0xab   :  { %v249_v49 = vpop.eup %248  ;;  %v116_v50 = vmul.f32 0.5, %v71_v47  ;;  %v120_v51 = vmul.f32 0.5, %v83_v48 }
  0xac   :  { %v251_v52 = vpop.eup %250  ;;  %v147_v53 = vadd.f32 1.0, %v249_v49  ;;  %v94_v54 = vpop.f32.mrf.mxu2 }
  0xad   :  { %v106_v55 = vpop.f32.mrf.mxu3  ;;  %v151_v56 = vadd.f32 1.0, %v251_v52  ;;  %256 = vtanh.f32 %v116_v50  ;;  %v95_v57 = vadd.f32 %v399_v32, %v94_v54 }
  0xae   :  { %v107_v58 = vadd.f32 %v399_v32, %v106_v55  ;;  %v163_v59 = vmul.f32 0.5, %v147_v53  ;;  %258 = vtanh.f32 %v120_v51 }
  0xaf   :  { %v253_v60 = vpop.eup %252  ;;  %v167_v61 = vmul.f32 0.5, %v151_v56  ;;  %v124_v62 = vmul.f32 0.5, %v95_v57 }
  0xb0   :  { %v128_v63 = vmul.f32 0.5, %v107_v58  ;;  %v255_v0 = vpop.eup %254  ;;  %179 = vst [vmem:[%s468_s3] sm:$0xff] %v163_v59  ;;  %v155_v1 = vadd.f32 1.0, %v253_v60  ;;  %v73_v2 = vpop.f32.mrf.mxu0 }
  0xb1   :  { %v85_v3 = vpop.f32.mrf.mxu1  ;;  %183 = vst [vmem:[%s468_s3 + $0x20] sm:$0xff] %v167_v61  ;;  %v159_v4 = vadd.f32 1.0, %v255_v0  ;;  %260 = vtanh.f32 %v124_v62  ;;  %v74_v5 = vadd.f32 %v399_v32, %v73_v2 }
  0xb2   :  { %v86_v6 = vadd.f32 %v399_v32, %v85_v3  ;;  %v171_v7 = vmul.f32 0.5, %v155_v1  ;;  %262 = vtanh.f32 %v128_v63 }
  0xb3   :  { %v257_v8 = vpop.eup %256  ;;  %v175_v9 = vmul.f32 0.5, %v159_v4  ;;  %v117_v10 = vmul.f32 0.5, %v74_v5 }
  0xb4   :  { %v121_v11 = vmul.f32 0.5, %v86_v6  ;;  %v259_v12 = vpop.eup %258  ;;  %187 = vst [vmem:[%s468_s3 + $0x40] sm:$0xff] %v171_v7  ;;  %v148_v13 = vadd.f32 1.0, %v257_v8  ;;  %v97_v14 = vpop.f32.mrf.mxu2 }
  0xb5   :  { %v109_v15 = vpop.f32.mrf.mxu3  ;;  %191 = vst [vmem:[%s468_s3 + $0x60] sm:$0xff] %v175_v9  ;;  %v152_v16 = vadd.f32 1.0, %v259_v12  ;;  %264 = vtanh.f32 %v117_v10  ;;  %v98_v17 = vadd.f32 %v399_v32, %v97_v14 }
  0xb6   :  { %v110_v18 = vadd.f32 %v399_v32, %v109_v15  ;;  %v164_v19 = vmul.f32 0.5, %v148_v13  ;;  %266 = vtanh.f32 %v121_v11 }
  0xb7   :  { %v261_v20 = vpop.eup %260  ;;  %v168_v21 = vmul.f32 0.5, %v152_v16  ;;  %v125_v22 = vmul.f32 0.5, %v98_v17 }
  0xb8   :  { %v129_v23 = vmul.f32 0.5, %v110_v18  ;;  %v263_v24 = vpop.eup %262  ;;  %180 = vst [vmem:[%s468_s3 + $0x8] sm:$0xff] %v164_v19  ;;  %v156_v25 = vadd.f32 1.0, %v261_v20  ;;  %v76_v26 = vpop.f32.mrf.mxu0 }
  0xb9   :  { %v88_v27 = vpop.f32.mrf.mxu1  ;;  %184 = vst [vmem:[%s468_s3 + $0x28] sm:$0xff] %v168_v21  ;;  %v160_v28 = vadd.f32 1.0, %v263_v24  ;;  %268 = vtanh.f32 %v125_v22  ;;  %v77_v29 = vadd.f32 %v399_v32, %v76_v26 }
  0xba   :  { %v89_v30 = vadd.f32 %v399_v32, %v88_v27  ;;  %v172_v31 = vmul.f32 0.5, %v156_v25  ;;  %270 = vtanh.f32 %v129_v23 }
  0xbb   :  { %v265_v33 = vpop.eup %264  ;;  %v176_v34 = vmul.f32 0.5, %v160_v28  ;;  %v118_v35 = vmul.f32 0.5, %v77_v29 }
  0xbc   :  { %v122_v36 = vmul.f32 0.5, %v89_v30  ;;  %v267_v37 = vpop.eup %266  ;;  %188 = vst [vmem:[%s468_s3 + $0x48] sm:$0xff] %v172_v31  ;;  %v149_v38 = vadd.f32 1.0, %v265_v33  ;;  %v100_v39 = vpop.f32.mrf.mxu2 }
  0xbd   :  { %v112_v40 = vpop.f32.mrf.mxu3  ;;  %192 = vst [vmem:[%s468_s3 + $0x68] sm:$0xff] %v176_v34  ;;  %v153_v41 = vadd.f32 1.0, %v267_v37  ;;  %272 = vtanh.f32 %v118_v35  ;;  %v101_v42 = vadd.f32 %v399_v32, %v100_v39 }
  0xbe   :  { %v113_v43 = vadd.f32 %v399_v32, %v112_v40  ;;  %v165_v44 = vmul.f32 0.5, %v149_v38  ;;  %274 = vtanh.f32 %v122_v36 }
  0xbf   :  { %v269_v45 = vpop.eup %268  ;;  %v169_v46 = vmul.f32 0.5, %v153_v41  ;;  %v126_v47 = vmul.f32 0.5, %v101_v42 }
  0xc0   :  { %v130_v48 = vmul.f32 0.5, %v113_v43  ;;  %v271_v49 = vpop.eup %270  ;;  %181 = vst [vmem:[%s468_s3 + $0x10] sm:$0xff] %v165_v44  ;;  %v157_v50 = vadd.f32 1.0, %v269_v45 }
  0xc1   :  { %185 = vst [vmem:[%s468_s3 + $0x30] sm:$0xff] %v169_v46  ;;  %v161_v51 = vadd.f32 1.0, %v271_v49  ;;  %276 = vtanh.f32 %v126_v47 }
  0xc2   :  { %v173_v52 = vmul.f32 0.5, %v157_v50  ;;  %278 = vtanh.f32 %v130_v48 }
  0xc3   :  { %v273_v32 = vpop.eup %272  ;;  %v177_v53 = vmul.f32 0.5, %v161_v51 }
  0xc4   :  { %v275_v54 = vpop.eup %274  ;;  %189 = vst [vmem:[%s468_s3 + $0x50] sm:$0xff] %v173_v52  ;;  %v150_v55 = vadd.f32 1.0, %v273_v32 }
  0xc5   :  { %193 = vst [vmem:[%s468_s3 + $0x70] sm:$0xff] %v177_v53  ;;  %v154_v56 = vadd.f32 1.0, %v275_v54 }
  0xc6   :  { %v166_v57 = vmul.f32 0.5, %v150_v55 }
  0xc7   :  { %v277_v58 = vpop.eup %276  ;;  %v170_v59 = vmul.f32 0.5, %v154_v56 }
  0xc8   :  { %v279_v60 = vpop.eup %278  ;;  %182 = vst [vmem:[%s468_s3 + $0x18] sm:$0xff] %v166_v57  ;;  %v158_v61 = vadd.f32 1.0, %v277_v58 }
  0xc9   :  { %186 = vst [vmem:[%s468_s3 + $0x38] sm:$0xff] %v170_v59  ;;  %v162_v62 = vadd.f32 1.0, %v279_v60 }
  0xca   :  { %v174_v63 = vmul.f32 0.5, %v158_v61 }
  0xcb   :  { %v178_v0 = vmul.f32 0.5, %v162_v62 }
  0xcc   :  { %190 = vst [vmem:[%s468_s3 + $0x58] sm:$0xff] %v174_v63 }
  0xcd   :  { %194 = vst [vmem:[%s468_s3 + $0x78] sm:$0xff] %v178_v0 }

</bundles_post_ra>
